<compile_context>
chip_gen: v5e
topology: v5e:2x2
jax: 0.10.0
libtpu: 0.0.40
codegen_flags: <defaults>
</compile_context>

<pallas_src>
import functools

import jax
import jax.numpy as jnp
from jax.experimental import pallas as pl
from jax.experimental.pallas import tpu as pltpu

KSIZE = 7
PAD = KSIZE // 2


# --------------------------------------------------------------------------
# Fused CBAM kernel: one batch element per grid step, lane-dense (C, H*W).
# --------------------------------------------------------------------------
def _cbam_kernel(x_ref, w1t_ref, w2t_ref, tapm_ref, o_ref, *, width):
    # x_ref   : VMEM (1, C, HW)
    # w1t_ref : VMEM (C, CR)        fc1 weight transposed
    # w2t_ref : VMEM (C, CR)        fc2 weight
    # tapm_ref: VMEM (49, 2, HW)    boundary-masked 7x7 taps per flat position
    #                               (row 0 = sum-map taps with 1/C folded in,
    #                                row 1 = max-map taps)
    # o_ref   : VMEM (1, C, HW)
    x = x_ref[0].astype(jnp.float32)                         # (C, HW)
    hw = x.shape[1]

    # ---- channel attention (spatial pooling + tiny MLP, exact f32 VPU) ----
    avg = jnp.sum(x, axis=1, keepdims=True) * (1.0 / hw)     # (C, 1) avg-pool
    mx = jnp.max(x, axis=1, keepdims=True)                   # (C, 1) max-pool

    w1t = w1t_ref[...]                                       # (C, CR)
    w2t = w2t_ref[...]                                       # (C, CR)
    # NOTE: fc2(relu(fc1(avg))) + fc2(relu(fc1(max))) == fc2(h_avg + h_max)
    # only because fc2 has no bias.  The MLP is tiny and off the critical
    # path; kept as exact-f32 VPU broadcast-multiply + reduce.
    h_avg = jnp.maximum(jnp.sum(w1t * avg, axis=0, keepdims=True), 0.0)   # (1, CR)
    h_max = jnp.maximum(jnp.sum(w1t * mx, axis=0, keepdims=True), 0.0)    # (1, CR)
    logits = jnp.sum(w2t * (h_avg + h_max), axis=1, keepdims=True)        # (C, 1)
    ca = jax.nn.sigmoid(logits)                               # (C, 1)

    y = x * ca                                                # (C, HW), lane broadcast

    # ---- spatial attention: channel sum/max maps, then 7x7 conv ----------
    # Raw channel sum (1/C of the mean is folded into the avg-channel taps).
    sum_map = jnp.sum(y, axis=0, keepdims=True)               # (1, HW)
    max_map = jnp.max(y, axis=0, keepdims=True)               # (1, HW)
    maps = jnp.concatenate([sum_map, max_map], axis=0)        # (2, HW)

    # 7x7 conv with zero padding, evaluated in the flat layout: for each of
    # the 49 (dh, dw) offsets, lane-roll the maps by dh*W+dw (XLU slot, free
    # alongside the VPU) and fma against the precomputed boundary-masked tap
    # map.  No unaligned VMEM slices, no Toeplitz matrices, no relayouts.
    acc = jnp.zeros_like(maps)                                # (2, HW) f32
    k = 0
    for dh in range(-PAD, PAD + 1):
        for dw in range(-PAD, PAD + 1):
            shift = dh * width + dw
            if shift == 0:
                rolled = maps
            else:
                # rolled[:, p] = maps[:, (p + shift) mod HW]; out-of-range
                # wrap-around positions are zeroed by the tap-map mask.
                rolled = pltpu.roll(maps, shift=(-shift) % hw, axis=1)
            acc = acc + rolled * tapm_ref[k]                  # (2, HW)
            k += 1
    conv = jnp.sum(acc, axis=0, keepdims=True)                # (1, HW)
    sa = jax.nn.sigmoid(conv)                                 # (1, HW)

    # ---- final multiply, lane-dense, single full-tile store ---------------
    o_ref[0] = (y * sa).astype(o_ref.dtype)


# --------------------------------------------------------------------------
# Wrapper
# --------------------------------------------------------------------------
def cbam_forward(x, w_fc1, w_fc2, w_spatial):
    """CBAM forward.

    x        : (N, C, H, W) float32
    w_fc1    : (C // r, C, 1, 1)  channel-attention fc1 (1x1 conv, no bias)
    w_fc2    : (C, C // r, 1, 1)  channel-attention fc2 (1x1 conv, no bias)
    w_spatial: (1, 2, 7, 7)       spatial-attention 7x7 conv (no bias)
    """
    N, C, H, W = x.shape
    CR = w_fc1.shape[0]
    HW = H * W

    x2 = x.reshape(N, C, HW)
    w1t = jnp.transpose(w_fc1.reshape(CR, C)).astype(jnp.float32)   # (C, CR)
    w2t = w_fc2.reshape(C, CR).astype(jnp.float32)                  # (C, CR)

    # Boundary-masked tap maps for the flat-layout 7x7 conv:
    #   tapm[k, c, p] = taps[c, dh, dw] if (h+dh, w+dw) in bounds else 0,
    # with k = (dh+PAD)*7 + (dw+PAD), p = h*W + w, and the channel-mean 1/C
    # folded into the avg-channel (c=0) taps.
    taps = w_spatial.reshape(2, KSIZE, KSIZE).astype(jnp.float32)
    taps = taps.at[0].multiply(1.0 / C)
    pos = jnp.arange(HW)
    hh = pos // W
    ww = pos % W
    rows = []
    for dh in range(-PAD, PAD + 1):
        for dw in range(-PAD, PAD + 1):
            valid = ((hh + dh >= 0) & (hh + dh < H) &
                     (ww + dw >= 0) & (ww + dw < W)).astype(jnp.float32)   # (HW,)
            rows.append(taps[:, dh + PAD, dw + PAD][:, None] * valid[None, :])
    tapm = jnp.stack(rows, axis=0)                                   # (49, 2, HW)

    kernel = functools.partial(_cbam_kernel, width=W)
    out2 = pl.pallas_call(
        kernel,
        out_shape=jax.ShapeDtypeStruct((N, C, HW), x.dtype),
        grid_spec=pltpu.PrefetchScalarGridSpec(
            num_scalar_prefetch=0,
            grid=(N,),
            in_specs=[
                pl.BlockSpec((1, C, HW), lambda n: (n, 0, 0)),
                pl.BlockSpec((C, CR), lambda n: (0, 0)),
                pl.BlockSpec((C, CR), lambda n: (0, 0)),
                pl.BlockSpec((KSIZE * KSIZE, 2, HW), lambda n: (0, 0, 0)),
            ],
            out_specs=pl.BlockSpec((1, C, HW), lambda n: (n, 0, 0)),
        ),
        compiler_params=pltpu.CompilerParams(
            dimension_semantics=("parallel",),
            vmem_limit_bytes=32 * 1024 * 1024,
        ),
    )(x2, w1t, w2t, tapm)
    return out2.reshape(N, C, H, W)


# --------------------------------------------------------------------------
# Pure-JAX reference
# --------------------------------------------------------------------------
def cbam_reference(x, w_fc1, w_fc2, w_spatial):
    C = x.shape[1]
    CR = w_fc1.shape[0]
    w1 = w_fc1.reshape(CR, C)
    w2 = w_fc2.reshape(C, CR)
    hi = jax.lax.Precision.HIGHEST

    def mlp(v):  # v: (N, C, 1, 1)
        h = jnp.einsum("nchw,oc->nohw", v, w1, precision=hi)
        h = jnp.maximum(h, 0.0)
        return jnp.einsum("nohw,co->nchw", h, w2, precision=hi)

    avg = jnp.mean(x, axis=(2, 3), keepdims=True)
    mx = jnp.max(x, axis=(2, 3), keepdims=True)
    ca = jax.nn.sigmoid(mlp(avg) + mlp(mx))
    y = x * ca

    savg = jnp.mean(y, axis=1, keepdims=True)
    smax = jnp.max(y, axis=1, keepdims=True)
    cat = jnp.concatenate([savg, smax], axis=1)
    conv = jax.lax.conv_general_dilated(
        cat, w_spatial, window_strides=(1, 1),
        padding=((PAD, PAD), (PAD, PAD)),
        dimension_numbers=("NCHW", "OIHW", "NCHW"),
        precision=hi)
    sa = jax.nn.sigmoid(conv)
    return y * sa


if __name__ == "__main__":
    key = jax.random.PRNGKey(0)
    kx, k1, k2, k3 = jax.random.split(key, 4)

    N, C, H, W = 2, 32, 16, 16          # reduction_ratio=16 -> hidden = 2
    REDUCTION = 16
    CR = C // REDUCTION

    x = jax.random.normal(kx, (N, C, H, W), dtype=jnp.float32)

    # Deterministic PyTorch-style uniform inits.
    b1 = 1.0 / (C ** 0.5)
    w_fc1 = jax.random.uniform(k1, (CR, C, 1, 1), minval=-b1, maxval=b1,
                               dtype=jnp.float32)
    b2 = 1.0 / (CR ** 0.5)
    w_fc2 = jax.random.uniform(k2, (C, CR, 1, 1), minval=-b2, maxval=b2,
                               dtype=jnp.float32)
    bs = 1.0 / ((2 * KSIZE * KSIZE) ** 0.5)
    w_sp = jax.random.uniform(k3, (1, 2, KSIZE, KSIZE), minval=-bs, maxval=bs,
                              dtype=jnp.float32)

    out = cbam_forward(x, w_fc1, w_fc2, w_sp)
    out = jax.block_until_ready(out)

    ref = cbam_reference(x, w_fc1, w_fc2, w_sp)
    assert out.shape == (N, C, H, W)
    err = float(jnp.max(jnp.abs(out - ref)))
    # All arithmetic is exact-f32 VPU/XLU (no MXU); typical error ~1e-6.
    assert err < 2e-3, err
    print("KERNEL_OK")
</pallas_src>

<mosaic_0001>
module attributes {stable_mosaic.version = 11 : i64} {
  func.func @_cbam_kernel(%arg0: i32, %arg1: memref<1x32x256xf32, #tpu.memory_space<vmem>>, %arg2: memref<32x2xf32, #tpu.memory_space<vmem>>, %arg3: memref<32x2xf32, #tpu.memory_space<vmem>>, %arg4: memref<49x2x256xf32, #tpu.memory_space<vmem>>, %arg5: memref<1x32x256xf32, #tpu.memory_space<vmem>>) attributes {dimension_semantics = [#tpu.dimension_semantics<parallel>], iteration_bounds = array<i64: 2>, scalar_prefetch = 0 : i64, scratch_operands = 0 : i64, tpu.core_type = #tpu.core_type<tc>, window_params = [{transform_indices = @transform_0, window_bounds = array<i64: 1, 32, 256>}, {pipeline_mode = #tpu.pipeline_mode<synchronous>, transform_indices = @transform_1, window_bounds = array<i64: 32, 2>}, {pipeline_mode = #tpu.pipeline_mode<synchronous>, transform_indices = @transform_2, window_bounds = array<i64: 32, 2>}, {pipeline_mode = #tpu.pipeline_mode<synchronous>, transform_indices = @transform_3, window_bounds = array<i64: 49, 2, 256>}, {transform_indices = @transform_4, window_bounds = array<i64: 1, 32, 256>}]} {
    %c0 = arith.constant 0 : index
    %c0_0 = arith.constant 0 : index
    %c0_1 = arith.constant 0 : index
    %0 = vector.load %arg1[%c0, %c0_0, %c0_1] : memref<1x32x256xf32, #tpu.memory_space<vmem>>, vector<1x32x256xf32>
    %1 = vector.shape_cast %0 : vector<1x32x256xf32> to vector<32x256xf32>
    %cst = arith.constant dense<0.000000e+00> : vector<32xf32>
    %2 = vector.multi_reduction <add>, %1, %cst [1] : vector<32x256xf32> to vector<32xf32>
    %3 = vector.shape_cast %2 : vector<32xf32> to vector<32x1xf32>
    %cst_2 = arith.constant 3.906250e-03 : f32
    %4 = vector.broadcast %cst_2 : f32 to vector<32x1xf32>
    %5 = arith.mulf %3, %4 : vector<32x1xf32>
    %cst_3 = arith.constant dense<0xFF800000> : vector<32xf32>
    %6 = vector.multi_reduction <maximumf>, %1, %cst_3 [1] : vector<32x256xf32> to vector<32xf32>
    %7 = vector.shape_cast %6 : vector<32xf32> to vector<32x1xf32>
    %c0_4 = arith.constant 0 : index
    %c0_5 = arith.constant 0 : index
    %8 = vector.load %arg2[%c0_4, %c0_5] : memref<32x2xf32, #tpu.memory_space<vmem>>, vector<32x2xf32>
    %c0_6 = arith.constant 0 : index
    %c0_7 = arith.constant 0 : index
    %9 = vector.load %arg3[%c0_6, %c0_7] : memref<32x2xf32, #tpu.memory_space<vmem>>, vector<32x2xf32>
    %10 = vector.broadcast %5 : vector<32x1xf32> to vector<32x2xf32>
    %11 = arith.mulf %8, %10 : vector<32x2xf32>
    %cst_8 = arith.constant dense<0.000000e+00> : vector<2xf32>
    %12 = vector.multi_reduction <add>, %11, %cst_8 [0] : vector<32x2xf32> to vector<2xf32>
    %13 = vector.shape_cast %12 : vector<2xf32> to vector<1x2xf32>
    %cst_9 = arith.constant 0.000000e+00 : f32
    %14 = vector.broadcast %cst_9 : f32 to vector<1x2xf32>
    %15 = arith.maximumf %13, %14 : vector<1x2xf32>
    %16 = vector.broadcast %7 : vector<32x1xf32> to vector<32x2xf32>
    %17 = arith.mulf %8, %16 : vector<32x2xf32>
    %cst_10 = arith.constant dense<0.000000e+00> : vector<2xf32>
    %18 = vector.multi_reduction <add>, %17, %cst_10 [0] : vector<32x2xf32> to vector<2xf32>
    %19 = vector.shape_cast %18 : vector<2xf32> to vector<1x2xf32>
    %cst_11 = arith.constant 0.000000e+00 : f32
    %20 = vector.broadcast %cst_11 : f32 to vector<1x2xf32>
    %21 = arith.maximumf %19, %20 : vector<1x2xf32>
    %22 = arith.addf %15, %21 : vector<1x2xf32>
    %23 = vector.broadcast %22 : vector<1x2xf32> to vector<32x2xf32>
    %24 = arith.mulf %9, %23 : vector<32x2xf32>
    %cst_12 = arith.constant dense<0.000000e+00> : vector<32xf32>
    %25 = vector.multi_reduction <add>, %24, %cst_12 [1] : vector<32x2xf32> to vector<32xf32>
    %26 = vector.shape_cast %25 : vector<32xf32> to vector<32x1xf32>
    %27 = arith.negf %26 : vector<32x1xf32>
    %28 = math.exp %27 : vector<32x1xf32>
    %cst_13 = arith.constant 1.000000e+00 : f32
    %29 = vector.broadcast %cst_13 : f32 to vector<32x1xf32>
    %30 = arith.addf %29, %28 : vector<32x1xf32>
    %31 = arith.divf %29, %30 : vector<32x1xf32>
    %32 = vector.broadcast %31 : vector<32x1xf32> to vector<32x256xf32>
    %33 = arith.mulf %1, %32 : vector<32x256xf32>
    %cst_14 = arith.constant dense<0.000000e+00> : vector<256xf32>
    %34 = vector.multi_reduction <add>, %33, %cst_14 [0] : vector<32x256xf32> to vector<256xf32>
    %35 = vector.shape_cast %34 : vector<256xf32> to vector<1x256xf32>
    %cst_15 = arith.constant dense<0xFF800000> : vector<256xf32>
    %36 = vector.multi_reduction <maximumf>, %33, %cst_15 [0] : vector<32x256xf32> to vector<256xf32>
    %37 = vector.shape_cast %36 : vector<256xf32> to vector<1x256xf32>
    %38 = tpu.concatenate %35, %37 in 0 : vector<1x256xf32>, vector<1x256xf32> -> vector<2x256xf32>
    %cst_16 = arith.constant 0.000000e+00 : f32
    %39 = vector.broadcast %cst_16 : f32 to vector<2x256xf32>
    %c51_i32 = arith.constant 51 : i32
    %40 = tpu.dynamic_rotate %38 by %c51_i32 dim 1 : vector<2x256xf32>, i32 -> vector<2x256xf32>
    %c0_17 = arith.constant 0 : index
    %c0_18 = arith.constant 0 : index
    %c0_19 = arith.constant 0 : index
    %41 = vector.load %arg4[%c0_17, %c0_18, %c0_19] : memref<49x2x256xf32, #tpu.memory_space<vmem>>, vector<1x2x256xf32>
    %42 = vector.shape_cast %41 : vector<1x2x256xf32> to vector<2x256xf32>
    %43 = arith.mulf %40, %42 : vector<2x256xf32>
    %44 = arith.addf %39, %43 : vector<2x256xf32>
    %c50_i32 = arith.constant 50 : i32
    %45 = tpu.dynamic_rotate %38 by %c50_i32 dim 1 : vector<2x256xf32>, i32 -> vector<2x256xf32>
    %c1 = arith.constant 1 : index
    %c0_20 = arith.constant 0 : index
    %c0_21 = arith.constant 0 : index
    %46 = vector.load %arg4[%c1, %c0_20, %c0_21] : memref<49x2x256xf32, #tpu.memory_space<vmem>>, vector<1x2x256xf32>
    %47 = vector.shape_cast %46 : vector<1x2x256xf32> to vector<2x256xf32>
    %48 = arith.mulf %45, %47 : vector<2x256xf32>
    %49 = arith.addf %44, %48 : vector<2x256xf32>
    %c49_i32 = arith.constant 49 : i32
    %50 = tpu.dynamic_rotate %38 by %c49_i32 dim 1 : vector<2x256xf32>, i32 -> vector<2x256xf32>
    %c2 = arith.constant 2 : index
    %c0_22 = arith.constant 0 : index
    %c0_23 = arith.constant 0 : index
    %51 = vector.load %arg4[%c2, %c0_22, %c0_23] : memref<49x2x256xf32, #tpu.memory_space<vmem>>, vector<1x2x256xf32>
    %52 = vector.shape_cast %51 : vector<1x2x256xf32> to vector<2x256xf32>
    %53 = arith.mulf %50, %52 : vector<2x256xf32>
    %54 = arith.addf %49, %53 : vector<2x256xf32>
    %c48_i32 = arith.constant 48 : i32
    %55 = tpu.dynamic_rotate %38 by %c48_i32 dim 1 : vector<2x256xf32>, i32 -> vector<2x256xf32>
    %c3 = arith.constant 3 : index
    %c0_24 = arith.constant 0 : index
    %c0_25 = arith.constant 0 : index
    %56 = vector.load %arg4[%c3, %c0_24, %c0_25] : memref<49x2x256xf32, #tpu.memory_space<vmem>>, vector<1x2x256xf32>
    %57 = vector.shape_cast %56 : vector<1x2x256xf32> to vector<2x256xf32>
    %58 = arith.mulf %55, %57 : vector<2x256xf32>
    %59 = arith.addf %54, %58 : vector<2x256xf32>
    %c47_i32 = arith.constant 47 : i32
    %60 = tpu.dynamic_rotate %38 by %c47_i32 dim 1 : vector<2x256xf32>, i32 -> vector<2x256xf32>
    %c4 = arith.constant 4 : index
    %c0_26 = arith.constant 0 : index
    %c0_27 = arith.constant 0 : index
    %61 = vector.load %arg4[%c4, %c0_26, %c0_27] : memref<49x2x256xf32, #tpu.memory_space<vmem>>, vector<1x2x256xf32>
    %62 = vector.shape_cast %61 : vector<1x2x256xf32> to vector<2x256xf32>
    %63 = arith.mulf %60, %62 : vector<2x256xf32>
    %64 = arith.addf %59, %63 : vector<2x256xf32>
    %c46_i32 = arith.constant 46 : i32
    %65 = tpu.dynamic_rotate %38 by %c46_i32 dim 1 : vector<2x256xf32>, i32 -> vector<2x256xf32>
    %c5 = arith.constant 5 : index
    %c0_28 = arith.constant 0 : index
    %c0_29 = arith.constant 0 : index
    %66 = vector.load %arg4[%c5, %c0_28, %c0_29] : memref<49x2x256xf32, #tpu.memory_space<vmem>>, vector<1x2x256xf32>
    %67 = vector.shape_cast %66 : vector<1x2x256xf32> to vector<2x256xf32>
    %68 = arith.mulf %65, %67 : vector<2x256xf32>
    %69 = arith.addf %64, %68 : vector<2x256xf32>
    %c45_i32 = arith.constant 45 : i32
    %70 = tpu.dynamic_rotate %38 by %c45_i32 dim 1 : vector<2x256xf32>, i32 -> vector<2x256xf32>
    %c6 = arith.constant 6 : index
    %c0_30 = arith.constant 0 : index
    %c0_31 = arith.constant 0 : index
    %71 = vector.load %arg4[%c6, %c0_30, %c0_31] : memref<49x2x256xf32, #tpu.memory_space<vmem>>, vector<1x2x256xf32>
    %72 = vector.shape_cast %71 : vector<1x2x256xf32> to vector<2x256xf32>
    %73 = arith.mulf %70, %72 : vector<2x256xf32>
    %74 = arith.addf %69, %73 : vector<2x256xf32>
    %c35_i32 = arith.constant 35 : i32
    %75 = tpu.dynamic_rotate %38 by %c35_i32 dim 1 : vector<2x256xf32>, i32 -> vector<2x256xf32>
    %c7 = arith.constant 7 : index
    %c0_32 = arith.constant 0 : index
    %c0_33 = arith.constant 0 : index
    %76 = vector.load %arg4[%c7, %c0_32, %c0_33] : memref<49x2x256xf32, #tpu.memory_space<vmem>>, vector<1x2x256xf32>
    %77 = vector.shape_cast %76 : vector<1x2x256xf32> to vector<2x256xf32>
    %78 = arith.mulf %75, %77 : vector<2x256xf32>
    %79 = arith.addf %74, %78 : vector<2x256xf32>
    %c34_i32 = arith.constant 34 : i32
    %80 = tpu.dynamic_rotate %38 by %c34_i32 dim 1 : vector<2x256xf32>, i32 -> vector<2x256xf32>
    %c8 = arith.constant 8 : index
    %c0_34 = arith.constant 0 : index
    %c0_35 = arith.constant 0 : index
    %81 = vector.load %arg4[%c8, %c0_34, %c0_35] : memref<49x2x256xf32, #tpu.memory_space<vmem>>, vector<1x2x256xf32>
    %82 = vector.shape_cast %81 : vector<1x2x256xf32> to vector<2x256xf32>
    %83 = arith.mulf %80, %82 : vector<2x256xf32>
    %84 = arith.addf %79, %83 : vector<2x256xf32>
    %c33_i32 = arith.constant 33 : i32
    %85 = tpu.dynamic_rotate %38 by %c33_i32 dim 1 : vector<2x256xf32>, i32 -> vector<2x256xf32>
    %c9 = arith.constant 9 : index
    %c0_36 = arith.constant 0 : index
    %c0_37 = arith.constant 0 : index
    %86 = vector.load %arg4[%c9, %c0_36, %c0_37] : memref<49x2x256xf32, #tpu.memory_space<vmem>>, vector<1x2x256xf32>
    %87 = vector.shape_cast %86 : vector<1x2x256xf32> to vector<2x256xf32>
    %88 = arith.mulf %85, %87 : vector<2x256xf32>
    %89 = arith.addf %84, %88 : vector<2x256xf32>
    %c32_i32 = arith.constant 32 : i32
    %90 = tpu.dynamic_rotate %38 by %c32_i32 dim 1 : vector<2x256xf32>, i32 -> vector<2x256xf32>
    %c10 = arith.constant 10 : index
    %c0_38 = arith.constant 0 : index
    %c0_39 = arith.constant 0 : index
    %91 = vector.load %arg4[%c10, %c0_38, %c0_39] : memref<49x2x256xf32, #tpu.memory_space<vmem>>, vector<1x2x256xf32>
    %92 = vector.shape_cast %91 : vector<1x2x256xf32> to vector<2x256xf32>
    %93 = arith.mulf %90, %92 : vector<2x256xf32>
    %94 = arith.addf %89, %93 : vector<2x256xf32>
    %c31_i32 = arith.constant 31 : i32
    %95 = tpu.dynamic_rotate %38 by %c31_i32 dim 1 : vector<2x256xf32>, i32 -> vector<2x256xf32>
    %c11 = arith.constant 11 : index
    %c0_40 = arith.constant 0 : index
    %c0_41 = arith.constant 0 : index
    %96 = vector.load %arg4[%c11, %c0_40, %c0_41] : memref<49x2x256xf32, #tpu.memory_space<vmem>>, vector<1x2x256xf32>
    %97 = vector.shape_cast %96 : vector<1x2x256xf32> to vector<2x256xf32>
    %98 = arith.mulf %95, %97 : vector<2x256xf32>
    %99 = arith.addf %94, %98 : vector<2x256xf32>
    %c30_i32 = arith.constant 30 : i32
    %100 = tpu.dynamic_rotate %38 by %c30_i32 dim 1 : vector<2x256xf32>, i32 -> vector<2x256xf32>
    %c12 = arith.constant 12 : index
    %c0_42 = arith.constant 0 : index
    %c0_43 = arith.constant 0 : index
    %101 = vector.load %arg4[%c12, %c0_42, %c0_43] : memref<49x2x256xf32, #tpu.memory_space<vmem>>, vector<1x2x256xf32>
    %102 = vector.shape_cast %101 : vector<1x2x256xf32> to vector<2x256xf32>
    %103 = arith.mulf %100, %102 : vector<2x256xf32>
    %104 = arith.addf %99, %103 : vector<2x256xf32>
    %c29_i32 = arith.constant 29 : i32
    %105 = tpu.dynamic_rotate %38 by %c29_i32 dim 1 : vector<2x256xf32>, i32 -> vector<2x256xf32>
    %c13 = arith.constant 13 : index
    %c0_44 = arith.constant 0 : index
    %c0_45 = arith.constant 0 : index
    %106 = vector.load %arg4[%c13, %c0_44, %c0_45] : memref<49x2x256xf32, #tpu.memory_space<vmem>>, vector<1x2x256xf32>
    %107 = vector.shape_cast %106 : vector<1x2x256xf32> to vector<2x256xf32>
    %108 = arith.mulf %105, %107 : vector<2x256xf32>
    %109 = arith.addf %104, %108 : vector<2x256xf32>
    %c19_i32 = arith.constant 19 : i32
    %110 = tpu.dynamic_rotate %38 by %c19_i32 dim 1 : vector<2x256xf32>, i32 -> vector<2x256xf32>
    %c14 = arith.constant 14 : index
    %c0_46 = arith.constant 0 : index
    %c0_47 = arith.constant 0 : index
    %111 = vector.load %arg4[%c14, %c0_46, %c0_47] : memref<49x2x256xf32, #tpu.memory_space<vmem>>, vector<1x2x256xf32>
    %112 = vector.shape_cast %111 : vector<1x2x256xf32> to vector<2x256xf32>
    %113 = arith.mulf %110, %112 : vector<2x256xf32>
    %114 = arith.addf %109, %113 : vector<2x256xf32>
    %c18_i32 = arith.constant 18 : i32
    %115 = tpu.dynamic_rotate %38 by %c18_i32 dim 1 : vector<2x256xf32>, i32 -> vector<2x256xf32>
    %c15 = arith.constant 15 : index
    %c0_48 = arith.constant 0 : index
    %c0_49 = arith.constant 0 : index
    %116 = vector.load %arg4[%c15, %c0_48, %c0_49] : memref<49x2x256xf32, #tpu.memory_space<vmem>>, vector<1x2x256xf32>
    %117 = vector.shape_cast %116 : vector<1x2x256xf32> to vector<2x256xf32>
    %118 = arith.mulf %115, %117 : vector<2x256xf32>
    %119 = arith.addf %114, %118 : vector<2x256xf32>
    %c17_i32 = arith.constant 17 : i32
    %120 = tpu.dynamic_rotate %38 by %c17_i32 dim 1 : vector<2x256xf32>, i32 -> vector<2x256xf32>
    %c16 = arith.constant 16 : index
    %c0_50 = arith.constant 0 : index
    %c0_51 = arith.constant 0 : index
    %121 = vector.load %arg4[%c16, %c0_50, %c0_51] : memref<49x2x256xf32, #tpu.memory_space<vmem>>, vector<1x2x256xf32>
    %122 = vector.shape_cast %121 : vector<1x2x256xf32> to vector<2x256xf32>
    %123 = arith.mulf %120, %122 : vector<2x256xf32>
    %124 = arith.addf %119, %123 : vector<2x256xf32>
    %c16_i32 = arith.constant 16 : i32
    %125 = tpu.dynamic_rotate %38 by %c16_i32 dim 1 : vector<2x256xf32>, i32 -> vector<2x256xf32>
    %c17 = arith.constant 17 : index
    %c0_52 = arith.constant 0 : index
    %c0_53 = arith.constant 0 : index
    %126 = vector.load %arg4[%c17, %c0_52, %c0_53] : memref<49x2x256xf32, #tpu.memory_space<vmem>>, vector<1x2x256xf32>
    %127 = vector.shape_cast %126 : vector<1x2x256xf32> to vector<2x256xf32>
    %128 = arith.mulf %125, %127 : vector<2x256xf32>
    %129 = arith.addf %124, %128 : vector<2x256xf32>
    %c15_i32 = arith.constant 15 : i32
    %130 = tpu.dynamic_rotate %38 by %c15_i32 dim 1 : vector<2x256xf32>, i32 -> vector<2x256xf32>
    %c18 = arith.constant 18 : index
    %c0_54 = arith.constant 0 : index
    %c0_55 = arith.constant 0 : index
    %131 = vector.load %arg4[%c18, %c0_54, %c0_55] : memref<49x2x256xf32, #tpu.memory_space<vmem>>, vector<1x2x256xf32>
    %132 = vector.shape_cast %131 : vector<1x2x256xf32> to vector<2x256xf32>
    %133 = arith.mulf %130, %132 : vector<2x256xf32>
    %134 = arith.addf %129, %133 : vector<2x256xf32>
    %c14_i32 = arith.constant 14 : i32
    %135 = tpu.dynamic_rotate %38 by %c14_i32 dim 1 : vector<2x256xf32>, i32 -> vector<2x256xf32>
    %c19 = arith.constant 19 : index
    %c0_56 = arith.constant 0 : index
    %c0_57 = arith.constant 0 : index
    %136 = vector.load %arg4[%c19, %c0_56, %c0_57] : memref<49x2x256xf32, #tpu.memory_space<vmem>>, vector<1x2x256xf32>
    %137 = vector.shape_cast %136 : vector<1x2x256xf32> to vector<2x256xf32>
    %138 = arith.mulf %135, %137 : vector<2x256xf32>
    %139 = arith.addf %134, %138 : vector<2x256xf32>
    %c13_i32 = arith.constant 13 : i32
    %140 = tpu.dynamic_rotate %38 by %c13_i32 dim 1 : vector<2x256xf32>, i32 -> vector<2x256xf32>
    %c20 = arith.constant 20 : index
    %c0_58 = arith.constant 0 : index
    %c0_59 = arith.constant 0 : index
    %141 = vector.load %arg4[%c20, %c0_58, %c0_59] : memref<49x2x256xf32, #tpu.memory_space<vmem>>, vector<1x2x256xf32>
    %142 = vector.shape_cast %141 : vector<1x2x256xf32> to vector<2x256xf32>
    %143 = arith.mulf %140, %142 : vector<2x256xf32>
    %144 = arith.addf %139, %143 : vector<2x256xf32>
    %c3_i32 = arith.constant 3 : i32
    %145 = tpu.dynamic_rotate %38 by %c3_i32 dim 1 : vector<2x256xf32>, i32 -> vector<2x256xf32>
    %c21 = arith.constant 21 : index
    %c0_60 = arith.constant 0 : index
    %c0_61 = arith.constant 0 : index
    %146 = vector.load %arg4[%c21, %c0_60, %c0_61] : memref<49x2x256xf32, #tpu.memory_space<vmem>>, vector<1x2x256xf32>
    %147 = vector.shape_cast %146 : vector<1x2x256xf32> to vector<2x256xf32>
    %148 = arith.mulf %145, %147 : vector<2x256xf32>
    %149 = arith.addf %144, %148 : vector<2x256xf32>
    %c2_i32 = arith.constant 2 : i32
    %150 = tpu.dynamic_rotate %38 by %c2_i32 dim 1 : vector<2x256xf32>, i32 -> vector<2x256xf32>
    %c22 = arith.constant 22 : index
    %c0_62 = arith.constant 0 : index
    %c0_63 = arith.constant 0 : index
    %151 = vector.load %arg4[%c22, %c0_62, %c0_63] : memref<49x2x256xf32, #tpu.memory_space<vmem>>, vector<1x2x256xf32>
    %152 = vector.shape_cast %151 : vector<1x2x256xf32> to vector<2x256xf32>
    %153 = arith.mulf %150, %152 : vector<2x256xf32>
    %154 = arith.addf %149, %153 : vector<2x256xf32>
    %c1_i32 = arith.constant 1 : i32
    %155 = tpu.dynamic_rotate %38 by %c1_i32 dim 1 : vector<2x256xf32>, i32 -> vector<2x256xf32>
    %c23 = arith.constant 23 : index
    %c0_64 = arith.constant 0 : index
    %c0_65 = arith.constant 0 : index
    %156 = vector.load %arg4[%c23, %c0_64, %c0_65] : memref<49x2x256xf32, #tpu.memory_space<vmem>>, vector<1x2x256xf32>
    %157 = vector.shape_cast %156 : vector<1x2x256xf32> to vector<2x256xf32>
    %158 = arith.mulf %155, %157 : vector<2x256xf32>
    %159 = arith.addf %154, %158 : vector<2x256xf32>
    %c24 = arith.constant 24 : index
    %c0_66 = arith.constant 0 : index
    %c0_67 = arith.constant 0 : index
    %160 = vector.load %arg4[%c24, %c0_66, %c0_67] : memref<49x2x256xf32, #tpu.memory_space<vmem>>, vector<1x2x256xf32>
    %161 = vector.shape_cast %160 : vector<1x2x256xf32> to vector<2x256xf32>
    %162 = arith.mulf %38, %161 : vector<2x256xf32>
    %163 = arith.addf %159, %162 : vector<2x256xf32>
    %c255_i32 = arith.constant 255 : i32
    %164 = tpu.dynamic_rotate %38 by %c255_i32 dim 1 : vector<2x256xf32>, i32 -> vector<2x256xf32>
    %c25 = arith.constant 25 : index
    %c0_68 = arith.constant 0 : index
    %c0_69 = arith.constant 0 : index
    %165 = vector.load %arg4[%c25, %c0_68, %c0_69] : memref<49x2x256xf32, #tpu.memory_space<vmem>>, vector<1x2x256xf32>
    %166 = vector.shape_cast %165 : vector<1x2x256xf32> to vector<2x256xf32>
    %167 = arith.mulf %164, %166 : vector<2x256xf32>
    %168 = arith.addf %163, %167 : vector<2x256xf32>
    %c254_i32 = arith.constant 254 : i32
    %169 = tpu.dynamic_rotate %38 by %c254_i32 dim 1 : vector<2x256xf32>, i32 -> vector<2x256xf32>
    %c26 = arith.constant 26 : index
    %c0_70 = arith.constant 0 : index
    %c0_71 = arith.constant 0 : index
    %170 = vector.load %arg4[%c26, %c0_70, %c0_71] : memref<49x2x256xf32, #tpu.memory_space<vmem>>, vector<1x2x256xf32>
    %171 = vector.shape_cast %170 : vector<1x2x256xf32> to vector<2x256xf32>
    %172 = arith.mulf %169, %171 : vector<2x256xf32>
    %173 = arith.addf %168, %172 : vector<2x256xf32>
    %c253_i32 = arith.constant 253 : i32
    %174 = tpu.dynamic_rotate %38 by %c253_i32 dim 1 : vector<2x256xf32>, i32 -> vector<2x256xf32>
    %c27 = arith.constant 27 : index
    %c0_72 = arith.constant 0 : index
    %c0_73 = arith.constant 0 : index
    %175 = vector.load %arg4[%c27, %c0_72, %c0_73] : memref<49x2x256xf32, #tpu.memory_space<vmem>>, vector<1x2x256xf32>
    %176 = vector.shape_cast %175 : vector<1x2x256xf32> to vector<2x256xf32>
    %177 = arith.mulf %174, %176 : vector<2x256xf32>
    %178 = arith.addf %173, %177 : vector<2x256xf32>
    %c243_i32 = arith.constant 243 : i32
    %179 = tpu.dynamic_rotate %38 by %c243_i32 dim 1 : vector<2x256xf32>, i32 -> vector<2x256xf32>
    %c28 = arith.constant 28 : index
    %c0_74 = arith.constant 0 : index
    %c0_75 = arith.constant 0 : index
    %180 = vector.load %arg4[%c28, %c0_74, %c0_75] : memref<49x2x256xf32, #tpu.memory_space<vmem>>, vector<1x2x256xf32>
    %181 = vector.shape_cast %180 : vector<1x2x256xf32> to vector<2x256xf32>
    %182 = arith.mulf %179, %181 : vector<2x256xf32>
    %183 = arith.addf %178, %182 : vector<2x256xf32>
    %c242_i32 = arith.constant 242 : i32
    %184 = tpu.dynamic_rotate %38 by %c242_i32 dim 1 : vector<2x256xf32>, i32 -> vector<2x256xf32>
    %c29 = arith.constant 29 : index
    %c0_76 = arith.constant 0 : index
    %c0_77 = arith.constant 0 : index
    %185 = vector.load %arg4[%c29, %c0_76, %c0_77] : memref<49x2x256xf32, #tpu.memory_space<vmem>>, vector<1x2x256xf32>
    %186 = vector.shape_cast %185 : vector<1x2x256xf32> to vector<2x256xf32>
    %187 = arith.mulf %184, %186 : vector<2x256xf32>
    %188 = arith.addf %183, %187 : vector<2x256xf32>
    %c241_i32 = arith.constant 241 : i32
    %189 = tpu.dynamic_rotate %38 by %c241_i32 dim 1 : vector<2x256xf32>, i32 -> vector<2x256xf32>
    %c30 = arith.constant 30 : index
    %c0_78 = arith.constant 0 : index
    %c0_79 = arith.constant 0 : index
    %190 = vector.load %arg4[%c30, %c0_78, %c0_79] : memref<49x2x256xf32, #tpu.memory_space<vmem>>, vector<1x2x256xf32>
    %191 = vector.shape_cast %190 : vector<1x2x256xf32> to vector<2x256xf32>
    %192 = arith.mulf %189, %191 : vector<2x256xf32>
    %193 = arith.addf %188, %192 : vector<2x256xf32>
    %c240_i32 = arith.constant 240 : i32
    %194 = tpu.dynamic_rotate %38 by %c240_i32 dim 1 : vector<2x256xf32>, i32 -> vector<2x256xf32>
    %c31 = arith.constant 31 : index
    %c0_80 = arith.constant 0 : index
    %c0_81 = arith.constant 0 : index
    %195 = vector.load %arg4[%c31, %c0_80, %c0_81] : memref<49x2x256xf32, #tpu.memory_space<vmem>>, vector<1x2x256xf32>
    %196 = vector.shape_cast %195 : vector<1x2x256xf32> to vector<2x256xf32>
    %197 = arith.mulf %194, %196 : vector<2x256xf32>
    %198 = arith.addf %193, %197 : vector<2x256xf32>
    %c239_i32 = arith.constant 239 : i32
    %199 = tpu.dynamic_rotate %38 by %c239_i32 dim 1 : vector<2x256xf32>, i32 -> vector<2x256xf32>
    %c32 = arith.constant 32 : index
    %c0_82 = arith.constant 0 : index
    %c0_83 = arith.constant 0 : index
    %200 = vector.load %arg4[%c32, %c0_82, %c0_83] : memref<49x2x256xf32, #tpu.memory_space<vmem>>, vector<1x2x256xf32>
    %201 = vector.shape_cast %200 : vector<1x2x256xf32> to vector<2x256xf32>
    %202 = arith.mulf %199, %201 : vector<2x256xf32>
    %203 = arith.addf %198, %202 : vector<2x256xf32>
    %c238_i32 = arith.constant 238 : i32
    %204 = tpu.dynamic_rotate %38 by %c238_i32 dim 1 : vector<2x256xf32>, i32 -> vector<2x256xf32>
    %c33 = arith.constant 33 : index
    %c0_84 = arith.constant 0 : index
    %c0_85 = arith.constant 0 : index
    %205 = vector.load %arg4[%c33, %c0_84, %c0_85] : memref<49x2x256xf32, #tpu.memory_space<vmem>>, vector<1x2x256xf32>
    %206 = vector.shape_cast %205 : vector<1x2x256xf32> to vector<2x256xf32>
    %207 = arith.mulf %204, %206 : vector<2x256xf32>
    %208 = arith.addf %203, %207 : vector<2x256xf32>
    %c237_i32 = arith.constant 237 : i32
    %209 = tpu.dynamic_rotate %38 by %c237_i32 dim 1 : vector<2x256xf32>, i32 -> vector<2x256xf32>
    %c34 = arith.constant 34 : index
    %c0_86 = arith.constant 0 : index
    %c0_87 = arith.constant 0 : index
    %210 = vector.load %arg4[%c34, %c0_86, %c0_87] : memref<49x2x256xf32, #tpu.memory_space<vmem>>, vector<1x2x256xf32>
    %211 = vector.shape_cast %210 : vector<1x2x256xf32> to vector<2x256xf32>
    %212 = arith.mulf %209, %211 : vector<2x256xf32>
    %213 = arith.addf %208, %212 : vector<2x256xf32>
    %c227_i32 = arith.constant 227 : i32
    %214 = tpu.dynamic_rotate %38 by %c227_i32 dim 1 : vector<2x256xf32>, i32 -> vector<2x256xf32>
    %c35 = arith.constant 35 : index
    %c0_88 = arith.constant 0 : index
    %c0_89 = arith.constant 0 : index
    %215 = vector.load %arg4[%c35, %c0_88, %c0_89] : memref<49x2x256xf32, #tpu.memory_space<vmem>>, vector<1x2x256xf32>
    %216 = vector.shape_cast %215 : vector<1x2x256xf32> to vector<2x256xf32>
    %217 = arith.mulf %214, %216 : vector<2x256xf32>
    %218 = arith.addf %213, %217 : vector<2x256xf32>
    %c226_i32 = arith.constant 226 : i32
    %219 = tpu.dynamic_rotate %38 by %c226_i32 dim 1 : vector<2x256xf32>, i32 -> vector<2x256xf32>
    %c36 = arith.constant 36 : index
    %c0_90 = arith.constant 0 : index
    %c0_91 = arith.constant 0 : index
    %220 = vector.load %arg4[%c36, %c0_90, %c0_91] : memref<49x2x256xf32, #tpu.memory_space<vmem>>, vector<1x2x256xf32>
    %221 = vector.shape_cast %220 : vector<1x2x256xf32> to vector<2x256xf32>
    %222 = arith.mulf %219, %221 : vector<2x256xf32>
    %223 = arith.addf %218, %222 : vector<2x256xf32>
    %c225_i32 = arith.constant 225 : i32
    %224 = tpu.dynamic_rotate %38 by %c225_i32 dim 1 : vector<2x256xf32>, i32 -> vector<2x256xf32>
    %c37 = arith.constant 37 : index
    %c0_92 = arith.constant 0 : index
    %c0_93 = arith.constant 0 : index
    %225 = vector.load %arg4[%c37, %c0_92, %c0_93] : memref<49x2x256xf32, #tpu.memory_space<vmem>>, vector<1x2x256xf32>
    %226 = vector.shape_cast %225 : vector<1x2x256xf32> to vector<2x256xf32>
    %227 = arith.mulf %224, %226 : vector<2x256xf32>
    %228 = arith.addf %223, %227 : vector<2x256xf32>
    %c224_i32 = arith.constant 224 : i32
    %229 = tpu.dynamic_rotate %38 by %c224_i32 dim 1 : vector<2x256xf32>, i32 -> vector<2x256xf32>
    %c38 = arith.constant 38 : index
    %c0_94 = arith.constant 0 : index
    %c0_95 = arith.constant 0 : index
    %230 = vector.load %arg4[%c38, %c0_94, %c0_95] : memref<49x2x256xf32, #tpu.memory_space<vmem>>, vector<1x2x256xf32>
    %231 = vector.shape_cast %230 : vector<1x2x256xf32> to vector<2x256xf32>
    %232 = arith.mulf %229, %231 : vector<2x256xf32>
    %233 = arith.addf %228, %232 : vector<2x256xf32>
    %c223_i32 = arith.constant 223 : i32
    %234 = tpu.dynamic_rotate %38 by %c223_i32 dim 1 : vector<2x256xf32>, i32 -> vector<2x256xf32>
    %c39 = arith.constant 39 : index
    %c0_96 = arith.constant 0 : index
    %c0_97 = arith.constant 0 : index
    %235 = vector.load %arg4[%c39, %c0_96, %c0_97] : memref<49x2x256xf32, #tpu.memory_space<vmem>>, vector<1x2x256xf32>
    %236 = vector.shape_cast %235 : vector<1x2x256xf32> to vector<2x256xf32>
    %237 = arith.mulf %234, %236 : vector<2x256xf32>
    %238 = arith.addf %233, %237 : vector<2x256xf32>
    %c222_i32 = arith.constant 222 : i32
    %239 = tpu.dynamic_rotate %38 by %c222_i32 dim 1 : vector<2x256xf32>, i32 -> vector<2x256xf32>
    %c40 = arith.constant 40 : index
    %c0_98 = arith.constant 0 : index
    %c0_99 = arith.constant 0 : index
    %240 = vector.load %arg4[%c40, %c0_98, %c0_99] : memref<49x2x256xf32, #tpu.memory_space<vmem>>, vector<1x2x256xf32>
    %241 = vector.shape_cast %240 : vector<1x2x256xf32> to vector<2x256xf32>
    %242 = arith.mulf %239, %241 : vector<2x256xf32>
    %243 = arith.addf %238, %242 : vector<2x256xf32>
    %c221_i32 = arith.constant 221 : i32
    %244 = tpu.dynamic_rotate %38 by %c221_i32 dim 1 : vector<2x256xf32>, i32 -> vector<2x256xf32>
    %c41 = arith.constant 41 : index
    %c0_100 = arith.constant 0 : index
    %c0_101 = arith.constant 0 : index
    %245 = vector.load %arg4[%c41, %c0_100, %c0_101] : memref<49x2x256xf32, #tpu.memory_space<vmem>>, vector<1x2x256xf32>
    %246 = vector.shape_cast %245 : vector<1x2x256xf32> to vector<2x256xf32>
    %247 = arith.mulf %244, %246 : vector<2x256xf32>
    %248 = arith.addf %243, %247 : vector<2x256xf32>
    %c211_i32 = arith.constant 211 : i32
    %249 = tpu.dynamic_rotate %38 by %c211_i32 dim 1 : vector<2x256xf32>, i32 -> vector<2x256xf32>
    %c42 = arith.constant 42 : index
    %c0_102 = arith.constant 0 : index
    %c0_103 = arith.constant 0 : index
    %250 = vector.load %arg4[%c42, %c0_102, %c0_103] : memref<49x2x256xf32, #tpu.memory_space<vmem>>, vector<1x2x256xf32>
    %251 = vector.shape_cast %250 : vector<1x2x256xf32> to vector<2x256xf32>
    %252 = arith.mulf %249, %251 : vector<2x256xf32>
    %253 = arith.addf %248, %252 : vector<2x256xf32>
    %c210_i32 = arith.constant 210 : i32
    %254 = tpu.dynamic_rotate %38 by %c210_i32 dim 1 : vector<2x256xf32>, i32 -> vector<2x256xf32>
    %c43 = arith.constant 43 : index
    %c0_104 = arith.constant 0 : index
    %c0_105 = arith.constant 0 : index
    %255 = vector.load %arg4[%c43, %c0_104, %c0_105] : memref<49x2x256xf32, #tpu.memory_space<vmem>>, vector<1x2x256xf32>
    %256 = vector.shape_cast %255 : vector<1x2x256xf32> to vector<2x256xf32>
    %257 = arith.mulf %254, %256 : vector<2x256xf32>
    %258 = arith.addf %253, %257 : vector<2x256xf32>
    %c209_i32 = arith.constant 209 : i32
    %259 = tpu.dynamic_rotate %38 by %c209_i32 dim 1 : vector<2x256xf32>, i32 -> vector<2x256xf32>
    %c44 = arith.constant 44 : index
    %c0_106 = arith.constant 0 : index
    %c0_107 = arith.constant 0 : index
    %260 = vector.load %arg4[%c44, %c0_106, %c0_107] : memref<49x2x256xf32, #tpu.memory_space<vmem>>, vector<1x2x256xf32>
    %261 = vector.shape_cast %260 : vector<1x2x256xf32> to vector<2x256xf32>
    %262 = arith.mulf %259, %261 : vector<2x256xf32>
    %263 = arith.addf %258, %262 : vector<2x256xf32>
    %c208_i32 = arith.constant 208 : i32
    %264 = tpu.dynamic_rotate %38 by %c208_i32 dim 1 : vector<2x256xf32>, i32 -> vector<2x256xf32>
    %c45 = arith.constant 45 : index
    %c0_108 = arith.constant 0 : index
    %c0_109 = arith.constant 0 : index
    %265 = vector.load %arg4[%c45, %c0_108, %c0_109] : memref<49x2x256xf32, #tpu.memory_space<vmem>>, vector<1x2x256xf32>
    %266 = vector.shape_cast %265 : vector<1x2x256xf32> to vector<2x256xf32>
    %267 = arith.mulf %264, %266 : vector<2x256xf32>
    %268 = arith.addf %263, %267 : vector<2x256xf32>
    %c207_i32 = arith.constant 207 : i32
    %269 = tpu.dynamic_rotate %38 by %c207_i32 dim 1 : vector<2x256xf32>, i32 -> vector<2x256xf32>
    %c46 = arith.constant 46 : index
    %c0_110 = arith.constant 0 : index
    %c0_111 = arith.constant 0 : index
    %270 = vector.load %arg4[%c46, %c0_110, %c0_111] : memref<49x2x256xf32, #tpu.memory_space<vmem>>, vector<1x2x256xf32>
    %271 = vector.shape_cast %270 : vector<1x2x256xf32> to vector<2x256xf32>
    %272 = arith.mulf %269, %271 : vector<2x256xf32>
    %273 = arith.addf %268, %272 : vector<2x256xf32>
    %c206_i32 = arith.constant 206 : i32
    %274 = tpu.dynamic_rotate %38 by %c206_i32 dim 1 : vector<2x256xf32>, i32 -> vector<2x256xf32>
    %c47 = arith.constant 47 : index
    %c0_112 = arith.constant 0 : index
    %c0_113 = arith.constant 0 : index
    %275 = vector.load %arg4[%c47, %c0_112, %c0_113] : memref<49x2x256xf32, #tpu.memory_space<vmem>>, vector<1x2x256xf32>
    %276 = vector.shape_cast %275 : vector<1x2x256xf32> to vector<2x256xf32>
    %277 = arith.mulf %274, %276 : vector<2x256xf32>
    %278 = arith.addf %273, %277 : vector<2x256xf32>
    %c205_i32 = arith.constant 205 : i32
    %279 = tpu.dynamic_rotate %38 by %c205_i32 dim 1 : vector<2x256xf32>, i32 -> vector<2x256xf32>
    %c48 = arith.constant 48 : index
    %c0_114 = arith.constant 0 : index
    %c0_115 = arith.constant 0 : index
    %280 = vector.load %arg4[%c48, %c0_114, %c0_115] : memref<49x2x256xf32, #tpu.memory_space<vmem>>, vector<1x2x256xf32>
    %281 = vector.shape_cast %280 : vector<1x2x256xf32> to vector<2x256xf32>
    %282 = arith.mulf %279, %281 : vector<2x256xf32>
    %283 = arith.addf %278, %282 : vector<2x256xf32>
    %cst_116 = arith.constant dense<0.000000e+00> : vector<256xf32>
    %284 = vector.multi_reduction <add>, %283, %cst_116 [0] : vector<2x256xf32> to vector<256xf32>
    %285 = vector.shape_cast %284 : vector<256xf32> to vector<1x256xf32>
    %286 = arith.negf %285 : vector<1x256xf32>
    %287 = math.exp %286 : vector<1x256xf32>
    %cst_117 = arith.constant 1.000000e+00 : f32
    %288 = vector.broadcast %cst_117 : f32 to vector<1x256xf32>
    %289 = arith.addf %288, %287 : vector<1x256xf32>
    %290 = arith.divf %288, %289 : vector<1x256xf32>
    %291 = vector.broadcast %290 : vector<1x256xf32> to vector<32x256xf32>
    %292 = arith.mulf %33, %291 : vector<32x256xf32>
    %c0_118 = arith.constant 0 : index
    %c0_119 = arith.constant 0 : index
    %c0_120 = arith.constant 0 : index
    %293 = vector.load %arg5[%c0_118, %c0_119, %c0_120] : memref<1x32x256xf32, #tpu.memory_space<vmem>>, vector<1x32x256xf32>
    %294 = vector.shape_cast %293 : vector<1x32x256xf32> to vector<32x256xf32>
    %295 = vector.shape_cast %292 : vector<32x256xf32> to vector<1x32x256xf32>
    tpu.vector_store %arg5[%c0_118, %c0_119, %c0_120], %295 {strides = array<i32>} : memref<1x32x256xf32, #tpu.memory_space<vmem>>, vector<1x32x256xf32>,
    return
  }
  func.func @transform_0(%arg0: i32) -> (i32, i32, i32) {
    %c0_i32 = arith.constant 0 : i32
    %c0_i32_0 = arith.constant 0 : i32
    %c0_i32_1 = arith.constant 0 : i32
    return %arg0, %c0_i32, %c0_i32_0 : i32, i32, i32
  }
  func.func @transform_1(%arg0: i32) -> (i32, i32) {
    %c0_i32 = arith.constant 0 : i32
    %c0_i32_0 = arith.constant 0 : i32
    %c0_i32_1 = arith.constant 0 : i32
    return %c0_i32, %c0_i32_0 : i32, i32
  }
  func.func @transform_2(%arg0: i32) -> (i32, i32) {
    %c0_i32 = arith.constant 0 : i32
    %c0_i32_0 = arith.constant 0 : i32
    %c0_i32_1 = arith.constant 0 : i32
    return %c0_i32, %c0_i32_0 : i32, i32
  }
  func.func @transform_3(%arg0: i32) -> (i32, i32, i32) {
    %c0_i32 = arith.constant 0 : i32
    %c0_i32_0 = arith.constant 0 : i32
    %c0_i32_1 = arith.constant 0 : i32
    %c0_i32_2 = arith.constant 0 : i32
    return %c0_i32, %c0_i32_0, %c0_i32_1 : i32, i32, i32
  }
  func.func @transform_4(%arg0: i32) -> (i32, i32, i32) {
    %c0_i32 = arith.constant 0 : i32
    %c0_i32_0 = arith.constant 0 : i32
    %c0_i32_1 = arith.constant 0 : i32
    return %arg0, %c0_i32, %c0_i32_0 : i32, i32, i32
  }
}

</mosaic_0001>

<bundles_post_ra>
// kernel: tpu_custom_call.1
= control target key start
LH: loop header
LB: loop body
LE: loop exit
PB: predicated region body
PF: predicated region fallthrough
CT: control target
= control target key end

     0   :  { %9 = vsyncpa [#allocation3], 0  ;;  %s2717_s0 = inlined_call_operand.hbm [shape: f32[2,32,256], index: 0, kind: input, shape index: {}]   ;;  %s2718_s1 = inlined_call_operand.vmem [shape: f32[32,2], index: 1, kind: input, shape index: {}]   ;;  %s2719_s2 = inlined_call_operand.vmem [shape: f32[32,2], index: 2, kind: input, shape index: {}]   ;;  %s2720_s3 = inlined_call_operand.hbm [shape: f32[49,2,256], index: 3, kind: input, shape index: {}]   ;;  %s2721_s4 = inlined_call_operand.hbm [shape: f32[2,32,256], index: 4, kind: output, shape index: {}]  }
   0x1   :  { %11 = vsyncpa [#allocation3 + $0x1], 0 }
   0x2   :  { %12 = vsyncpa [#allocation6], 0 }
   0x3   :  { %13 = vsyncpa [#allocation4], 0 }
   0x4   :  { %15 = vsyncpa [#allocation4 + $0x1], 0  ;;  %s1918_s15 = smov 0   ;;  %s1920_s16 = smov 0  }
   0x5   :  { %s1922_s17 = smov 0   ;;  %s1924_s18 = smov 0  }
   0x6 LB: > { %s1939_s19 = sadd.s32 4294967295, %s1837_s18   ;;  %s1549_s20 = sadd.s32 4294967294, %s1837_s18   ;;  %s1837_s18 = sphi %s1924_s18, %s2777_s18   ;;  %s1833_s17 = sphi %s1922_s17, %s2776_s17   ;;  %s1829_s16 = sphi %s1920_s16, %s2775_s16   ;;  %s1825_s15 = sphi %s1918_s15, %s2774_s15  }
   0x7   : > { %p41_p0 = scmp.ne.s32.totalorder %s1829_s16, %s1825_s15  ;;  %p42_p1 = scmp.eq.s32.totalorder %s1939_s19, 0 }
   0x8   : > { %p128_p2 = scmp.eq.s32.totalorder %s1939_s19, 1  ;;  %p134_p3 = scmp.eq.s32.totalorder %s1549_s20, 1 }
   0x9   : > { %p1948_p4 = por %p42_p1, %p41_p0  ;;  %p1550_p5 = scmp.ge.s32.totalorder %s1837_s18, 1 }
   0xa   : > { %p1953_p6 = por %p134_p3, %p41_p0  ;;  %p141_p7 = scmp.lt.s32.totalorder %s1837_s18, 3 }
   0xb   : > { %s158_s25 = sshll.u32 %s2720_s3, 4  ;;  %s1839_s27 = smov [#allocation5]   ;;  %s159_s25 = int_to_ptr.hbm [resolvable:$true] %s158_s25 }
   0xc   : > { %p1961_p8 = pnand %p1550_p5, %p141_p7  ;;  %s160_s28 = sshll.u32 %s1839_s27, 4  ;;  %s161_s28 = int_to_ptr.vmem [resolvable:$true] %s160_s28 }
   0xd   : > { %s1971_s29 = sadd.s32 1, %s1837_s18   ;;  %s1840_s30 = smov 64  }
   0xe   : > { %p1581_p9 = pneg %p1961_p8  ;;  %s1841_s5 = smov 4  }
   0xf   : > { %s25_s6 = ssub.s32 %s1837_s18, %s1971_s29  ;;  %s28_s7 = sadd.s32 1, %s1833_s17 }
  0x10   : > { %p1582_p10 = pnand %p1581_p9, %p42_p1  ;;  %p26_p12 = scmp.eq.s32.totalorder %s25_s6, 0 }
  0x11   : > { %p35_p13 = scmp.ne.s32.totalorder %s1833_s17, %s1829_s16  ;;  %p36_p0 = scmp.eq.s32.totalorder %s1837_s18, 0 }
  0x12   : > { %1584 = dma.hbm_to_vmem [thread:$0]  (!%p1582_p10), %s159_s25, 3136, %s161_s28, [#allocation6], %s1840_s30, %s1840_s30, %s1841_s5  }
  0x13   : > { %p1594_p3 = scmp.lt.s32.totalorder %s1837_s18, 2  ;;  %p37_p5 = por %p36_p0, %p35_p13 }
  0x14   : > { %s1981_s8 = scalar_select %p26_p12, %s1833_s17, %s28_s7  }
  0x15   : > { %p1985_p7 = por %p128_p2, %p35_p13  ;;  %s174_s10 = sand.u32 1, %s1833_s17  }
  0x16   : > { %s1571_s11 = sshll.u32 %s1837_s18, 6  ;;  %s1553_s12 = sshll.u32 %s174_s10, 6 }
  0x17   : > { %s183_s20 = scalar_lea.hbm %s2717_s0, %s1571_s11  ;;  %s178_s24 = scalar_lea.vmem [#allocation2], %s1553_s12 }
  0x18   : > { %s184_s23 = sshll.u32 %s183_s20, 4  ;;  %s186_s25 = sshll.u32 %s178_s24, 4  ;;  %s185_s23 = int_to_ptr.hbm [resolvable:$true] %s184_s23  ;;  %s187_s25 = int_to_ptr.vmem [resolvable:$true] %s186_s25 }
  0x19   : > { %p1996_p9 = pnand %p1594_p3, %p37_p5  ;;  %s175_s28 = scalar_lea.sflag [#allocation3], %s174_s10 }
  0x1a   : > { %s1737_s30 = sshra.s32 %s185_s23, 4  ;;  %s1744_s11 = scalar_lea.hbm %s2717_s0, 128  ;;  %s1738_s30 = int_to_ptr.hbm [resolvable:$true] %s1737_s30 }
  0x1b   : > { %s1739_s5 = scalar_lea.hbm %s1738_s30, 64  ;;  %p1741_p10 = pneg %p1996_p9 }
  0x1c   : > { %p1740_p2 = scmp.ne.s32.totalorder %s1738_s30, %s1739_s5  ;;  %p1745_p0 = scmp.lt.s32.totalorder %s1738_s30, %s2717_s0 }
  0x1d   : > { %p1746_p3 = scmp.lt.s32.totalorder %s1744_s11, %s1739_s5 }
  0x1e   : > { %p1742_p12 = pnand %p1741_p10, %p1740_p2 }
  0x1f   : > { %p1747_p5 = por %p1746_p3, %p1745_p0 }
  0x20   : > { %p1743_p13 = pneg %p1742_p12 }
  0x22   : > { %p1748_p11 = pnand %p1747_p5, %p1743_p13 }
  0x24   : > { %1751 = shalt.err (!%p1748_p11)
}
  0x25   : > { %s1842_s10 = smov 256   ;;  %s1843_s14 = smov 16  }
  0x26   : > { %1588 = dma.hbm_to_vmem [thread:$0]  (!%p1996_p9), %s185_s23, 1024, %s187_s25, %s175_s28, %s1842_s10, %s1842_s10, %s1843_s14  }
  0x27   : > { %198 = sbr.rel (%p1961_p8) target bundleno = 811 (0x32b), region = 36 }
  0x2c   : > { %s2013_s20 = sand.u32 1, %s1829_s16  }
  0x2d   : > { %s1557_s24 = sshll.u32 %s2013_s20, 6  ;;  %s201_s30 = scalar_lea.sflag [#allocation3], %s2013_s20 }
  0x2e   : > { %s204_s5 = scalar_lea.vmem [#allocation2], %s1557_s24 }
  0x2f   : > { %1812 = dma.done.wait (%p1948_p4), %s201_s30, 1024  }
  0x30   : > { %1814 = vsyncadd (%p1948_p4), %s201_s30, 4294966272 }
  0x31   : > { %1816 = dma.done.wait (%p42_p1), [#allocation6], 3136  }
  0x32   : > { %1818 = vsyncadd (%p42_p1), [#allocation6], 4294964160  ;;  %v2027_v0 = vld [vmem:[%s204_s5 + $0x20] sm:$0xff]  ;;  %v2029_v1 = vld [vmem:[%s204_s5 + $0x28] sm:$0xff]  ;;  %vm283_vm0 = vcmask 15360   ;;  %s1844_s26 = smov 51  }
  0x33   : > { %v2031_v2 = vld [vmem:[%s204_s5] sm:$0xff]  ;;  %v249_v3 = vadd.f32 %v2029_v1, %v2027_v0  ;;  %v2035_v4 = vld [vmem:[%s204_s5 + $0x8] sm:$0xff]  ;;  %v2037_v5 = vld [vmem:[%s204_s5 + $0x10] sm:$0xff]  ;;  %v265_v15 = vmax.f32 %v2027_v0, %v2029_v1  ;;  %s1845_s23 = smov 50   ;;  %s1846_s25 = smov 49  }
  0x34   : > { %v2039_v6 = vld [vmem:[%s204_s5 + $0x18] sm:$0xff]  ;;  %v243_v7 = vadd.f32 %v2035_v4, %v2031_v2  ;;  %v2045_v9 = vld [vmem:[%s204_s5 + $0x30] sm:$0xff]  ;;  %v259_v11 = vmax.f32 %v2031_v2, %v2035_v4  ;;  %v465_v16 = vld [vmem:[#allocation5] sm:$0xf]  ;;  %s1847_s27 = smov 47   ;;  %s1848_s28 = smov 48  }
  0x35   : > { %v262_v8 = vmax.f32 %v2037_v5, %v2039_v6  ;;  %250 = vadd.xlane.f32.xlu1 %v249_v3  ;;  %v2047_v10 = vld [vmem:[%s204_s5 + $0x38] sm:$0xff]  ;;  %v246_v12 = vadd.f32 %v2039_v6, %v2037_v5  ;;  %467 = vst [vmem:[#allocation1] ss:$4 sm:$0xff] %v465_v16  ;;  %v484_v19 = vld [vmem:[#allocation5 + $0x4] sm:$0xf]  ;;  %v273_v33 = vld [vmem:[%s2718_s1 + $0x10] sm:$0xff] }
  0x36   : > { %244 = vadd.xlane.f32.xlu0 %v243_v7  ;;  %v252_v13 = vadd.f32 %v2047_v10, %v2045_v9  ;;  %v268_v14 = vmax.f32 %v2045_v9, %v2047_v10  ;;  %v503_v23 = vld [vmem:[#allocation5 + $0x8] sm:$0xf]  ;;  %v271_v27 = vld [vmem:[%s2718_s1] sm:$0xff]  ;;  %v272_v29 = vld [vmem:[%s2718_s1 + $0x8] sm:$0xff]  ;;  %s1849_s6 = smov 46   ;;  %s1850_s7 = smov 35  }
  0x37   : > { %263 = vmax.xlane.f32.xlu2 %v262_v8  ;;  %v274_v34 = vld [vmem:[%s2718_s1 + $0x18] sm:$0xff]  ;;  %v522_v38 = vld [vmem:[#allocation5 + $0xc] sm:$0xf]  ;;  %s1851_s11 = smov 45   ;;  %s1852_s12 = smov 34  }
  0x38   : > { %v541_v60 = vld [vmem:[#allocation5 + $0x10] sm:$0xf]  ;;  %s1853_s13 = smov 32   ;;  %s1854_s10 = smov 33  }
  0x39   : > { %s1855_s14 = smov 31   ;;  %s1856_s30 = smov 29  }
  0x3a   : > { %s1857_s5 = smov 30   ;;  %s1858_s21 = smov 19  }
  0x3c   : > { %v2059_v17 = vld.sshfl [vmem:[#allocation1] sm:$0xff pattern:$0x73625140]  ;;  %v2061_v18 = vld.sshfl [vmem:[#allocation1 + $0x8] sm:$0xff pattern:$0x73625140] }
  0x3d   : > { %260 = vmax.xlane.f32.xlu1 %v259_v11  ;;  %486 = vst [vmem:[#allocation1] ss:$4 sm:$0xff] %v484_v19  ;;  %v560_v19 = vld [vmem:[#allocation5 + $0x14] sm:$0xf] }
  0x3e   : > { %247 = vadd.xlane.f32.xlu0 %v246_v12 }
  0x3f   : > { %253 = vadd.xlane.f32.xlu2 %v252_v13 }
  0x44   : > { %v2063_v24 = vld.sshfl [vmem:[#allocation1] sm:$0xff pattern:$0x73625140]  ;;  %v2065_v25 = vld.sshfl [vmem:[#allocation1 + $0x8] sm:$0xff pattern:$0x73625140] }
  0x45   : > { %269 = vmax.xlane.f32.xlu1 %v268_v14  ;;  %505 = vst [vmem:[#allocation1] ss:$4 sm:$0xff] %v503_v23 }
  0x46   : > { %266 = vmax.xlane.f32.xlu0 %v265_v15 }
  0x4c   : > { %v2079_v40 = vld.sshfl [vmem:[#allocation1] sm:$0xff pattern:$0x73625140]  ;;  %v2081_v45 = vld.sshfl [vmem:[#allocation1 + $0x8] sm:$0xff pattern:$0x73625140] }
  0x4d   : > { %524 = vst [vmem:[#allocation1] ss:$4 sm:$0xff] %v522_v38 }
  0x54   : > { %v2091_v63 = vld.sshfl [vmem:[#allocation1] sm:$0xff pattern:$0x73625140]  ;;  %v2093_v8 = vld.sshfl [vmem:[#allocation1 + $0x8] sm:$0xff pattern:$0x73625140] }
  0x55   : > { %543 = vst [vmem:[#allocation1] ss:$4 sm:$0xff] %v541_v60 }
  0x5c   : > { %v2097_v23 = vld.sshfl [vmem:[#allocation1 + $0x8] sm:$0xff pattern:$0x73625140] }
  0xa8   : > { %v251_v20 = vpop.xlane.xlu1 %250 }
  0xa9   : > { %v245_v21 = vpop.xlane.xlu0 %244  ;;  %v257_v28 = vmul.f32 0.00390625, %v251_v20 }
  0xaa   : > { %v264_v22 = vpop.xlane.xlu2 %263  ;;  %v255_v26 = vmul.f32 0.00390625, %v245_v21 }
  0xab   : > { %v299_v39 = vmul.f32 %v272_v29, %v264_v22  ;;  %v281_v43 = vmul.f32 %v273_v33, %v257_v28  ;;  %v2095_v22 = vld.sshfl [vmem:[#allocation1] sm:$0xff pattern:$0x73625140] }
  0xac   : > { %v279_v35 = vmul.f32 %v271_v27, %v255_v26  ;;  %562 = vst [vmem:[#allocation1] ss:$4 sm:$0xff] %v560_v19  ;;  %v731_v19 = vld [vmem:[#allocation5 + $0x38] sm:$0xf] }
  0xad   : > { %v303_v49 = vsel %vm283_vm0, %v299_v39, 0.0  ;;  %v287_v51 = vsel %vm283_vm0, %v281_v43, 0.0 }
  0xae   : > { %v284_v46 = vsel %vm283_vm0, %v279_v35, 0.0  ;;  %v275_v35 = vld [vmem:[%s2719_s2] sm:$0xff] }
  0xb0   : > { %v261_v30 = vpop.xlane.xlu1 %260 }
  0xb1   : > { %v248_v31 = vpop.xlane.xlu0 %247  ;;  %v298_v41 = vmul.f32 %v271_v27, %v261_v30  ;;  %v579_v30 = vld [vmem:[#allocation5 + $0x18] sm:$0xf] }
  0xb2   : > { %v254_v32 = vpop.xlane.xlu2 %253  ;;  %v256_v36 = vmul.f32 0.00390625, %v248_v31 }
  0xb3   : > { %v258_v37 = vmul.f32 0.00390625, %v254_v32  ;;  %v302_v50 = vsel %vm283_vm0, %v298_v41, 0.0 }
  0xb4   : > { %v280_v42 = vmul.f32 %v272_v29, %v256_v36  ;;  %v304_v58 = vadd.f32 %v303_v49, %v302_v50  ;;  %v2108_v36 = vld.sshfl [vmem:[#allocation1] sm:$0xff pattern:$0x73625140] }
  0xb5   : > { %v282_v44 = vmul.f32 %v274_v34, %v258_v37  ;;  %v2110_v37 = vld.sshfl [vmem:[#allocation1 + $0x8] sm:$0xff pattern:$0x73625140] }
  0xb6   : > { %v285_v47 = vsel %vm283_vm0, %v280_v42, 0.0  ;;  %581 = vst [vmem:[#allocation1] ss:$4 sm:$0xff] %v579_v30 }
  0xb7   : > { %v286_v48 = vadd.f32 %v285_v47, %v284_v46  ;;  %v289_v52 = vsel %vm283_vm0, %v282_v44, 0.0  ;;  %v598_v47 = vld [vmem:[#allocation5 + $0x1c] sm:$0xf] }
  0xb8   : > { %v270_v53 = vpop.xlane.xlu1 %269 }
  0xb9   : > { %v288_v54 = vadd.f32 %v287_v51, %v286_v48  ;;  %v267_v55 = vpop.xlane.xlu0 %266  ;;  %v301_v56 = vmul.f32 %v274_v34, %v270_v53  ;;  %v276_v34 = vld [vmem:[%s2719_s2 + $0x8] sm:$0xff]  ;;  %v278_v48 = vld [vmem:[%s2719_s2 + $0x18] sm:$0xff] }
  0xba   : > { %v300_v57 = vmul.f32 %v273_v33, %v267_v55  ;;  %v277_v33 = vld [vmem:[%s2719_s2 + $0x10] sm:$0xff]  ;;  %v617_v53 = vld [vmem:[#allocation5 + $0x20] sm:$0xf] }
  0xbb   : > { %v290_v59 = vadd.f32 %v289_v52, %v288_v54  ;;  %v307_v62 = vsel %vm283_vm0, %v301_v56, 0.0  ;;  %v636_v56 = vld [vmem:[#allocation5 + $0x24] sm:$0xf] }
  0xbc   : > { %v305_v61 = vsel %vm283_vm0, %v300_v57, 0.0 }
  0xbd   : > { %v306_v3 = vadd.f32 %v305_v61, %v304_v58  ;;  %v291_v7 = vrot.slane %v290_v59, 4  ;;  %v2118_v49 = vld.sshfl [vmem:[#allocation1] sm:$0xff pattern:$0x73625140] }
  0xbe   : > { %v2120_v50 = vld.sshfl [vmem:[#allocation1 + $0x8] sm:$0xff pattern:$0x73625140] }
  0xbf   : > { %v292_v11 = vadd.f32 %v291_v7, %v290_v59  ;;  %v308_v12 = vadd.f32 %v307_v62, %v306_v3  ;;  %600 = vst [vmem:[#allocation1] ss:$4 sm:$0xff] %v598_v47  ;;  %v655_v59 = vld [vmem:[#allocation5 + $0x28] sm:$0xf]  ;;  %v674_v62 = vld [vmem:[#allocation5 + $0x2c] sm:$0xf] }
  0xc1   : > { %v293_v13 = vrot.slane %v292_v11, 2  ;;  %v309_v14 = vrot.slane %v308_v12, 4 }
  0xc3   : > { %v294_v15 = vadd.f32 %v293_v13, %v292_v11  ;;  %v310_v16 = vadd.f32 %v309_v14, %v308_v12  ;;  %v693_v11 = vld [vmem:[#allocation5 + $0x30] sm:$0xf]  ;;  %v712_v14 = vld [vmem:[#allocation5 + $0x34] sm:$0xf] }
  0xc5   : > { %v295_v20 = vrot.slane %v294_v15, 1  ;;  %v311_v21 = vrot.slane %v310_v16, 2 }
  0xc6   : > { %v2123_v54 = vld.sshfl [vmem:[#allocation1] sm:$0xff pattern:$0x73625140]  ;;  %v2125_v55 = vld.sshfl [vmem:[#allocation1 + $0x8] sm:$0xff pattern:$0x73625140] }
  0xc7   : > { %v312_v26 = vadd.f32 %v311_v21, %v310_v16  ;;  %v296_v27 = vadd.f32 %v295_v20, %v294_v15  ;;  %619 = vst [vmem:[#allocation1] ss:$4 sm:$0xff] %v617_v53 }
  0xc9   : > { %v313_v28 = vrot.slane %v312_v26, 1  ;;  %v297_v31 = vmax.f32 %v296_v27, 0.0 }
  0xcb   : > { %v314_v29 = vadd.f32 %v313_v28, %v312_v26  ;;  %v750_v26 = vld [vmem:[#allocation5 + $0x3c] sm:$0xf] }
  0xcd   : > { %v315_v32 = vmax.f32 %v314_v29, 0.0  ;;  %v769_v29 = vld [vmem:[#allocation5 + $0x40] sm:$0xf] }
  0xce   : > { %v2127_v57 = vld.sshfl [vmem:[#allocation1] sm:$0xff pattern:$0x73625140]  ;;  %v2129_v58 = vld.sshfl [vmem:[#allocation1 + $0x8] sm:$0xff pattern:$0x73625140] }
  0xcf   : > { %v316_v38 = vadd.f32 %v315_v32, %v297_v31  ;;  %638 = vst [vmem:[#allocation1] ss:$4 sm:$0xff] %v636_v56  ;;  %v788_v32 = vld [vmem:[#allocation5 + $0x44] sm:$0xf] }
  0xd1   : > { %v319_v39 = vmul.f32 %v316_v38, %v277_v33  ;;  %v318_v41 = vmul.f32 %v316_v38, %v276_v34  ;;  %v317_v42 = vmul.f32 %v316_v38, %v275_v35  ;;  %v320_v51 = vmul.f32 %v316_v38, %v278_v48  ;;  %v807_v35 = vld [vmem:[#allocation5 + $0x48] sm:$0xf]  ;;  %v864_v48 = vld [vmem:[#allocation5 + $0x54] sm:$0xf] }
  0xd3   : > { %v327_v43 = vsel %vm283_vm0, %v319_v39, 0.0  ;;  %v324_v44 = vsel %vm283_vm0, %v318_v41, 0.0  ;;  %v321_v46 = vsel %vm283_vm0, %v317_v42, 0.0  ;;  %v330_v52 = vsel %vm283_vm0, %v320_v51, 0.0  ;;  %v826_v41 = vld [vmem:[#allocation5 + $0x4c] sm:$0xf] }
  0xd4   : > { %328 = vadd.xlane.f32.xlu1 %v327_v43  ;;  %325 = vadd.xlane.f32.xlu0 %v324_v44  ;;  %v845_v44 = vld [vmem:[#allocation5 + $0x50] sm:$0xf] }
  0xd5   : > { %322 = vadd.xlane.f32.xlu2 %v321_v46 }
  0xd6   : > { %v2131_v60 = vld.sshfl [vmem:[#allocation1] sm:$0xff pattern:$0x73625140]  ;;  %v2133_v61 = vld.sshfl [vmem:[#allocation1 + $0x8] sm:$0xff pattern:$0x73625140] }
  0xd7   : > { %657 = vst [vmem:[#allocation1] ss:$4 sm:$0xff] %v655_v59 }
  0xdd   : > { %331 = vadd.xlane.f32.xlu2 %v330_v52 }
  0xde   : > { %v2135_v3 = vld.sshfl [vmem:[#allocation1] sm:$0xff pattern:$0x73625140]  ;;  %v2137_v7 = vld.sshfl [vmem:[#allocation1 + $0x8] sm:$0xff pattern:$0x73625140] }
  0xdf   : > { %676 = vst [vmem:[#allocation1] ss:$4 sm:$0xff] %v674_v62 }
  0xe6   : > { %v2139_v12 = vld.sshfl [vmem:[#allocation1] sm:$0xff pattern:$0x73625140]  ;;  %v2141_v13 = vld.sshfl [vmem:[#allocation1 + $0x8] sm:$0xff pattern:$0x73625140] }
  0xe7   : > { %695 = vst [vmem:[#allocation1] ss:$4 sm:$0xff] %v693_v11 }
  0xee   : > { %v2143_v15 = vld.sshfl [vmem:[#allocation1] sm:$0xff pattern:$0x73625140]  ;;  %v2145_v16 = vld.sshfl [vmem:[#allocation1 + $0x8] sm:$0xff pattern:$0x73625140] }
  0xef   : > { %714 = vst [vmem:[#allocation1] ss:$4 sm:$0xff] %v712_v14 }
  0xf6   : > { %v2147_v20 = vld.sshfl [vmem:[#allocation1] sm:$0xff pattern:$0x73625140]  ;;  %v2149_v21 = vld.sshfl [vmem:[#allocation1 + $0x8] sm:$0xff pattern:$0x73625140] }
  0xf7   : > { %733 = vst [vmem:[#allocation1] ss:$4 sm:$0xff] %v731_v19  ;;  %v883_v19 = vld [vmem:[#allocation5 + $0x58] sm:$0xf] }
  0xfe   : > { %v2151_v27 = vld.sshfl [vmem:[#allocation1] sm:$0xff pattern:$0x73625140]  ;;  %v2153_v28 = vld.sshfl [vmem:[#allocation1 + $0x8] sm:$0xff pattern:$0x73625140] }
  0xff   : > { %752 = vst [vmem:[#allocation1] ss:$4 sm:$0xff] %v750_v26 }
 0x106   : > { %v2155_v30 = vld.sshfl [vmem:[#allocation1] sm:$0xff pattern:$0x73625140]  ;;  %v2157_v31 = vld.sshfl [vmem:[#allocation1 + $0x8] sm:$0xff pattern:$0x73625140] }
 0x107   : > { %771 = vst [vmem:[#allocation1] ss:$4 sm:$0xff] %v769_v29 }
 0x10e   : > { %v2159_v33 = vld.sshfl [vmem:[#allocation1] sm:$0xff pattern:$0x73625140]  ;;  %v2161_v34 = vld.sshfl [vmem:[#allocation1 + $0x8] sm:$0xff pattern:$0x73625140] }
 0x10f   : > { %2731 = vst [vmem:[#allocation11_spill] sm:$0xff] %v2159_v33 }
 0x110   : > { %2732 = vst [vmem:[#allocation12_spill] sm:$0xff] %v2161_v34 }
 0x111   : > { %790 = vst [vmem:[#allocation1] ss:$4 sm:$0xff] %v788_v32 }
 0x118   : > { %v2163_v38 = vld.sshfl [vmem:[#allocation1] sm:$0xff pattern:$0x73625140]  ;;  %v2165_v39 = vld.sshfl [vmem:[#allocation1 + $0x8] sm:$0xff pattern:$0x73625140] }
 0x119   : > { %2733 = vst [vmem:[#allocation13_spill] sm:$0xff] %v2163_v38 }
 0x11a   : > { %2734 = vst [vmem:[#allocation14_spill] sm:$0xff] %v2165_v39 }
 0x11b   : > { %809 = vst [vmem:[#allocation1] ss:$4 sm:$0xff] %v807_v35 }
 0x122   : > { %v2167_v42 = vld.sshfl [vmem:[#allocation1] sm:$0xff pattern:$0x73625140]  ;;  %v2169_v43 = vld.sshfl [vmem:[#allocation1 + $0x8] sm:$0xff pattern:$0x73625140] }
 0x123   : > { %2735 = vst [vmem:[#allocation15_spill] sm:$0xff] %v2167_v42 }
 0x124   : > { %2736 = vst [vmem:[#allocation16_spill] sm:$0xff] %v2169_v43 }
 0x125   : > { %828 = vst [vmem:[#allocation1] ss:$4 sm:$0xff] %v826_v41 }
 0x12c   : > { %v2171_v46 = vld.sshfl [vmem:[#allocation1] sm:$0xff pattern:$0x73625140]  ;;  %v2173_v47 = vld.sshfl [vmem:[#allocation1 + $0x8] sm:$0xff pattern:$0x73625140] }
 0x12d   : > { %2737 = vst [vmem:[#allocation17_spill] sm:$0xff] %v2171_v46 }
 0x12e   : > { %2738 = vst [vmem:[#allocation18_spill] sm:$0xff] %v2173_v47 }
 0x12f   : > { %847 = vst [vmem:[#allocation1] ss:$4 sm:$0xff] %v845_v44 }
 0x136   : > { %v2175_v51 = vld.sshfl [vmem:[#allocation1] sm:$0xff pattern:$0x73625140]  ;;  %v2177_v52 = vld.sshfl [vmem:[#allocation1 + $0x8] sm:$0xff pattern:$0x73625140] }
 0x137   : > { %2739 = vst [vmem:[#allocation19_spill] sm:$0xff] %v2175_v51 }
 0x138   : > { %2740 = vst [vmem:[#allocation20_spill] sm:$0xff] %v2177_v52 }
 0x139   : > { %866 = vst [vmem:[#allocation1] ss:$4 sm:$0xff] %v864_v48 }
 0x140   : > { %v2179_v26 = vld.sshfl [vmem:[#allocation1] sm:$0xff pattern:$0x73625140]  ;;  %v2181_v29 = vld.sshfl [vmem:[#allocation1 + $0x8] sm:$0xff pattern:$0x73625140] }
 0x141   : > { %2741 = vst [vmem:[#allocation21_spill] sm:$0xff] %v2179_v26 }
 0x142   : > { %2742 = vst [vmem:[#allocation22_spill] sm:$0xff] %v2181_v29 }
 0x143   : > { %885 = vst [vmem:[#allocation1] ss:$4 sm:$0xff] %v883_v19 }
 0x147   : > { %v329_v53 = vpop.xlane.xlu1 %328  ;;  %v326_v56 = vpop.xlane.xlu0 %325 }
 0x148   : > { %v1562_v59 = vmul.f32 -1.442695, %v329_v53  ;;  %v1561_v62 = vmul.f32 -1.442695, %v326_v56  ;;  %v323_v11 = vpop.xlane.xlu2 %322 }
 0x149   : > { %v1560_v14 = vmul.f32 -1.442695, %v323_v11 }
 0x14a   : > { %1683 = vpow2.f32 %v1562_v59  ;;  %v902_v59 = vld [vmem:[#allocation5 + $0x5c] sm:$0xf]  ;;  %v2188_v11 = vld.sshfl [vmem:[#allocation1 + $0x8] sm:$0xff pattern:$0x73625140] }
 0x14b   : > { %1685 = vpow2.f32 %v1561_v62  ;;  %v2186_v62 = vld.sshfl [vmem:[#allocation1] sm:$0xff pattern:$0x73625140]  ;;  %2744 = vst [vmem:[#allocation24_spill] sm:$0xff] %v2188_v11 }
 0x14c   : > { %1687 = vpow2.f32 %v1560_v14  ;;  %2743 = vst [vmem:[#allocation23_spill] sm:$0xff] %v2186_v62  ;;  %v914_v62 = vld [vmem:[#allocation5 + $0x60] sm:$0xf] }
 0x14d   : > { %904 = vst [vmem:[#allocation1] ss:$4 sm:$0xff] %v902_v59 }
 0x150   : > { %v1684_v32 = vpop.eup %1683  ;;  %v332_v35 = vpop.xlane.xlu2 %331 }
 0x151   : > { %v1686_v41 = vpop.eup %1685  ;;  %v2183_v44 = vadd.f32 1.0, %v1684_v32  ;;  %v1563_v52 = vmul.f32 -1.442695, %v332_v35 }
 0x152   : > { %v1688_v48 = vpop.eup %1687  ;;  %v346_v53 = vadd.f32 1.0, %v1686_v41 }
 0x153   : > { %1689 = vrcp.f32 %v2183_v44  ;;  %v345_v56 = vadd.f32 1.0, %v1688_v48  ;;  %v390_v42 = vand.u32 2147483648, %v2183_v44  ;;  %vm384_vm6 = vweird.f32 %v2183_v44 }
 0x154   : > { %1691 = vrcp.f32 %v346_v53  ;;  %v375_v48 = vand.u32 2147483648, %v346_v53  ;;  %v373_v59 = vand.u32 2147483647, %v346_v53  ;;  %v2194_v11 = vld.sshfl [vmem:[#allocation1] sm:$0xff pattern:$0x73625140]  ;;  %vm369_vm2 = vweird.f32 %v346_v53 }
 0x155   : > { %1693 = vpow2.f32 %v1563_v52  ;;  %2745 = vst [vmem:[#allocation25_spill] sm:$0xff] %v2194_v11  ;;  %v360_v38 = vand.u32 2147483648, %v345_v56  ;;  %vm354_vm9 = vweird.f32 %v345_v56 }
 0x156   : > { %1695 = vrcp.f32 %v345_v56  ;;  %vm374_vm7 = vcmp.eq.f32.partialorder %v373_v59, 8.507059e+37 }
 0x159   : > { %v1690_v14 = vpop.eup %1689 }
 0x15a   : > { %v1692_v19 = vpop.eup %1691  ;;  %v380_v32 = vmul.f32 %v1690_v14, %v2183_v44  ;;  %vm385_vm3 = vweird.f32 %v1690_v14 }
 0x15b   : > { %v1694_v29 = vpop.eup %1693  ;;  %v365_v35 = vmul.f32 %v1692_v19, %v346_v53  ;;  %vm370_vm1 = vweird.f32 %v1692_v19  ;;  %vm2200_vm8 = vmor %vm384_vm6, %vm385_vm3 }
 0x15c   : > { %v381_v26 = vsub.f32 1.0, %v380_v32  ;;  %v2191_v41 = vadd.f32 1.0, %v1694_v29  ;;  %v1696_v51 = vpop.eup %1695  ;;  %v2197_v32 = vld.sshfl [vmem:[#allocation1 + $0x8] sm:$0xff pattern:$0x73625140]  ;;  %vm371_vm4 = vmor %vm369_vm2, %vm370_vm1  ;;  %vm453_vm1 = vcmask 1040384  }
 0x15d   : > { %v366_v47 = vsub.f32 1.0, %v365_v35  ;;  %v350_v46 = vmul.f32 %v1696_v51, %v345_v56  ;;  %2746 = vst [vmem:[#allocation26_spill] sm:$0xff] %v2197_v32  ;;  %v376_v35 = vor.u32 1.1754944e-38, %v375_v48  ;;  %vm355_vm5 = vweird.f32 %v1696_v51 }
 0x15e   : > { %v382_v52 = vmul.f32 %v1690_v14, %v381_v26  ;;  %1697 = vrcp.f32 %v2191_v41  ;;  %916 = vst [vmem:[#allocation1] ss:$4 sm:$0xff] %v914_v62  ;;  %vm356_vm10 = vmor %vm354_vm9, %vm355_vm5  ;;  %v361_v62 = vor.u32 1.1754944e-38, %v360_v38  ;;  %v391_v32 = vor.u32 1.1754944e-38, %v390_v42 }
 0x15f   : > { %v367_v43 = vmul.f32 %v1692_v19, %v366_v47  ;;  %v351_v39 = vsub.f32 1.0, %v350_v46  ;;  %v358_v47 = vand.u32 2147483647, %v345_v56  ;;  %v388_v46 = vand.u32 2147483647, %v2183_v44 }
 0x160   : > { %v383_v26 = vadd.f32 %v1690_v14, %v382_v52  ;;  %v405_v56 = vand.u32 2147483648, %v2191_v41  ;;  %vm399_vm14 = vweird.f32 %v2191_v41 }
 0x161   : > { %v368_v29 = vadd.f32 %v1692_v19, %v367_v43  ;;  %v352_v34 = vmul.f32 %v1696_v51, %v351_v39  ;;  %vm359_vm11 = vcmp.eq.f32.partialorder %v358_v47, 8.507059e+37  ;;  %vm389_vm12 = vcmp.eq.f32.partialorder %v388_v46, 8.507059e+37 }
 0x162   : > { %v387_v52 = vsel %vm2200_vm8, %v1690_v14, %v383_v26 }
 0x163   : > { %v372_v33 = vsel %vm371_vm4, %v1692_v19, %v368_v29  ;;  %v353_v48 = vadd.f32 %v1696_v51, %v352_v34  ;;  %v392_v42 = vsel %vm389_vm12, %v391_v32, %v387_v52  ;;  %v406_v32 = vor.u32 1.1754944e-38, %v405_v56 }
 0x164   : > { %v1698_v11 = vpop.eup %1697  ;;  %v377_v43 = vsel %vm374_vm7, %v376_v35, %v372_v33 }
 0x165   : > { %v395_v39 = vmul.f32 %v1698_v11, %v2191_v41  ;;  %v357_v19 = vsel %vm356_vm10, %v1696_v51, %v353_v48  ;;  %v2209_v59 = vmul.f32 %v377_v43, %v2037_v5  ;;  %v2212_v29 = vmul.f32 %v377_v43, %v2039_v6 }
 0x166   : > { %v362_v44 = vsel %vm359_vm11, %v361_v62, %v357_v19  ;;  %vm400_vm13 = vweird.f32 %v1698_v11  ;;  %v403_v5 = vand.u32 2147483647, %v2191_v41 }
 0x167   : > { %v396_v33 = vsub.f32 1.0, %v395_v39  ;;  %v2215_v34 = vmul.f32 %v362_v44, %v2031_v2  ;;  %v2218_v38 = vmul.f32 %v362_v44, %v2035_v4  ;;  %v2228_v2 = vmul.f32 %v392_v42, %v2027_v0  ;;  %vm401_vm15 = vmor %vm399_vm14, %vm400_vm13 }
 0x168   : > { %v2231_v4 = vmul.f32 %v392_v42, %v2029_v1  ;;  %vm404_vm0 = vcmp.eq.f32.partialorder %v403_v5, 8.507059e+37 }
 0x169   : > { %v397_v51 = vmul.f32 %v1698_v11, %v396_v33  ;;  %v417_v6 = vadd.f32 %v2209_v59, %v2215_v34  ;;  %v426_v14 = vadd.f32 %v2212_v29, %v2218_v38  ;;  %2749 = vst [vmem:[#allocation27_spill] sm:$0xff] %v2228_v2  ;;  %v435_v0 = vmax.f32 %v2215_v34, %v2228_v2 }
 0x16a   : > { %2750 = vst [vmem:[#allocation28_spill] sm:$0xff] %v2231_v4  ;;  %v444_v1 = vmax.f32 %v2218_v38, %v2231_v4 }
 0x16b   : > { %v398_v35 = vadd.f32 %v1698_v11, %v397_v51  ;;  %v418_v53 = vadd.f32 %v417_v6, %v2228_v2  ;;  %v427_v46 = vadd.f32 %v426_v14, %v2231_v4 }
 0x16d   : > { %v402_v26 = vsel %vm401_vm15, %v1698_v11, %v398_v35 }
 0x16e   : > { %v407_v47 = vsel %vm404_vm0, %v406_v32, %v402_v26 }
 0x16f   : > { %v2236_v43 = vmul.f32 %v407_v47, %v2045_v9  ;;  %v2239_v41 = vmul.f32 %v407_v47, %v2047_v10 }
 0x171   : > { %2751 = vst [vmem:[#allocation29_spill] sm:$0xff] %v2236_v43  ;;  %v419_v11 = vadd.f32 %v418_v53, %v2236_v43  ;;  %v428_v48 = vadd.f32 %v427_v46, %v2239_v41  ;;  %v436_v62 = vmax.f32 %v2209_v59, %v2236_v43  ;;  %v445_v9 = vmax.f32 %v2212_v29, %v2239_v41 }
 0x172   : > { %2752 = vst [vmem:[#allocation30_spill] sm:$0xff] %v2239_v41 }
 0x173   : > { %v420_v39 = vrot.slane %v419_v11, 4  ;;  %v429_v52 = vrot.slane %v428_v48, 4  ;;  %v437_v10 = vmax.f32 %v435_v0, %v436_v62  ;;  %v446_v19 = vmax.f32 %v444_v1, %v445_v9 }
 0x175   : > { %v421_v44 = vadd.f32 %v420_v39, %v419_v11  ;;  %v430_v33 = vadd.f32 %v429_v52, %v428_v48  ;;  %v438_v56 = vrot.slane %v437_v10, 4  ;;  %v447_v42 = vrot.slane %v446_v19, 4 }
 0x177   : > { %v422_v51 = vrot.slane %v421_v44, 2  ;;  %v431_v5 = vrot.slane %v430_v33, 2  ;;  %v439_v6 = vmax.f32 %v437_v10, %v438_v56  ;;  %v448_v14 = vmax.f32 %v446_v19, %v447_v42 }
 0x179   : > { %v423_v35 = vadd.f32 %v422_v51, %v421_v44  ;;  %v432_v32 = vadd.f32 %v431_v5, %v430_v33  ;;  %v440_v26 = vrot.slane %v439_v6, 2  ;;  %v449_v47 = vrot.slane %v448_v14, 2 }
 0x17b   : > { %v424_v53 = vrot.slane %v423_v35, 1  ;;  %v433_v46 = vrot.slane %v432_v32, 1  ;;  %v441_v43 = vmax.f32 %v439_v6, %v440_v26  ;;  %v450_v41 = vmax.f32 %v448_v14, %v449_v47 }
 0x17d   : > { %v442_v4 = vrot.slane %v441_v43, 1  ;;  %v451_v2 = vrot.slane %v450_v41, 1  ;;  %v425_v0 = vadd.f32 %v424_v53, %v423_v35  ;;  %v434_v1 = vadd.f32 %v433_v46, %v432_v32 }
 0x17f   : > { %v443_v11 = vmax.f32 %v441_v43, %v442_v4  ;;  %v452_v48 = vmax.f32 %v450_v41, %v451_v2  ;;  %v460_v43 = vlaneseq }
 0x181   : > { %v2251_v62 = vsel %vm453_vm1, %v425_v0, %v443_v11  ;;  %v2253_v9 = vsel %vm453_vm1, %v434_v1, %v452_v48  ;;  %v2299_v39 = vand.u32 127, %v460_v43 }
 0x182   : > { %458 = vrot.lane.b32.xlu1 %v2253_v9, %s1844_s26  ;;  %476 = vrot.lane.b32.xlu2 %v2251_v62, %s1845_s23 }
 0x183   : > { %456 = vrot.lane.b32.xlu0 %v2251_v62, %s1844_s26  ;;  %s1859_s26 = smov 17   ;;  %vm462_vm2 = vcmp.lt.s32.totalorder %v2299_v39, 51  ;;  %vm499_vm3 = vcmp.lt.s32.totalorder %v2299_v39, 49  ;;  %vm480_vm4 = vcmp.lt.s32.totalorder %v2299_v39, 50  ;;  %vm518_vm5 = vcmp.lt.s32.totalorder %v2299_v39, 48 }
 0x184   : > { %vm556_vm6 = vcmp.lt.s32.totalorder %v2299_v39, 46  ;;  %vm537_vm7 = vcmp.lt.s32.totalorder %v2299_v39, 47  ;;  %vm575_vm8 = vcmp.lt.s32.totalorder %v2299_v39, 45  ;;  %vm613_vm9 = vcmp.lt.s32.totalorder %v2299_v39, 34 }
 0x185   : > { %vm594_vm10 = vcmp.lt.s32.totalorder %v2299_v39, 35  ;;  %vm632_vm11 = vcmp.lt.s32.totalorder %v2299_v39, 33  ;;  %vm670_vm12 = vcmp.lt.s32.totalorder %v2299_v39, 31  ;;  %vm651_vm13 = vcmp.lt.s32.totalorder %v2299_v39, 32 }
 0x186   : > { %vm689_vm14 = vcmp.lt.s32.totalorder %v2299_v39, 30  ;;  %vm727_vm15 = vcmp.lt.s32.totalorder %v2299_v39, 19  ;;  %vm708_vm0 = vcmp.lt.s32.totalorder %v2299_v39, 29  ;;  %vm746_vm1 = vcmp.lt.s32.totalorder %v2299_v39, 18 }
 0x18a   : > { %497 = vrot.lane.b32.xlu1 %v2253_v9, %s1846_s25  ;;  %495 = vrot.lane.b32.xlu2 %v2251_v62, %s1846_s25  ;;  %s1861_s25 = smov 16  }
 0x18b   : > { %478 = vrot.lane.b32.xlu0 %v2253_v9, %s1845_s23  ;;  %s1860_s23 = smov 18  }
 0x192   : > { %533 = vrot.lane.b32.xlu1 %v2251_v62, %s1847_s27  ;;  %516 = vrot.lane.b32.xlu2 %v2253_v9, %s1848_s28 }
 0x193   : > { %514 = vrot.lane.b32.xlu0 %v2251_v62, %s1848_s28  ;;  %s1863_s28 = smov 15  }
 0x19a   : > { %554 = vrot.lane.b32.xlu1 %v2253_v9, %s1849_s6  ;;  %552 = vrot.lane.b32.xlu2 %v2251_v62, %s1849_s6  ;;  %s1864_s6 = smov 13  }
 0x19b   : > { %535 = vrot.lane.b32.xlu0 %v2253_v9, %s1847_s27  ;;  %s1862_s27 = smov 14  }
 0x1a2   : > { %590 = vrot.lane.b32.xlu1 %v2251_v62, %s1850_s7  ;;  %573 = vrot.lane.b32.xlu2 %v2253_v9, %s1851_s11 }
 0x1a3   : > { %571 = vrot.lane.b32.xlu0 %v2251_v62, %s1851_s11  ;;  %s1866_s11 = smov 3  }
 0x1aa   : > { %611 = vrot.lane.b32.xlu1 %v2253_v9, %s1852_s12  ;;  %609 = vrot.lane.b32.xlu2 %v2251_v62, %s1852_s12  ;;  %s1867_s12 = smov 1  }
 0x1ab   : > { %592 = vrot.lane.b32.xlu0 %v2253_v9, %s1850_s7  ;;  %s1865_s7 = smov 2  }
 0x1b2   : > { %647 = vrot.lane.b32.xlu1 %v2251_v62, %s1853_s13  ;;  %630 = vrot.lane.b32.xlu2 %v2253_v9, %s1854_s10 }
 0x1b3   : > { %628 = vrot.lane.b32.xlu0 %v2251_v62, %s1854_s10  ;;  %s1869_s10 = smov 127  }
 0x1ba   : > { %668 = vrot.lane.b32.xlu1 %v2253_v9, %s1855_s14  ;;  %666 = vrot.lane.b32.xlu2 %v2251_v62, %s1855_s14  ;;  %s1870_s14 = smov 125  }
 0x1bb   : > { %649 = vrot.lane.b32.xlu0 %v2253_v9, %s1853_s13  ;;  %s1868_s13 = smov 126  }
 0x1c2   : > { %704 = vrot.lane.b32.xlu1 %v2251_v62, %s1856_s30  ;;  %687 = vrot.lane.b32.xlu2 %v2253_v9, %s1857_s5 }
 0x1c3   : > { %685 = vrot.lane.b32.xlu0 %v2251_v62, %s1857_s5  ;;  %s1872_s5 = smov 115  }
 0x1ca   : > { %725 = vrot.lane.b32.xlu1 %v2253_v9, %s1858_s21  ;;  %723 = vrot.lane.b32.xlu2 %v2251_v62, %s1858_s21  ;;  %s1873_s21 = smov 113  }
 0x1cb   : > { %706 = vrot.lane.b32.xlu0 %v2253_v9, %s1856_s30  ;;  %s1871_s30 = smov 114  }
 0x1d2   : > { %761 = vrot.lane.b32.xlu1 %v2251_v62, %s1859_s26  ;;  %744 = vrot.lane.b32.xlu2 %v2253_v9, %s1860_s23 }
 0x1d3   : > { %742 = vrot.lane.b32.xlu0 %v2251_v62, %s1860_s23  ;;  %s1875_s23 = smov 112  }
 0x1da   : > { %782 = vrot.lane.b32.xlu1 %v2253_v9, %s1861_s25  ;;  %780 = vrot.lane.b32.xlu2 %v2251_v62, %s1861_s25 }
 0x1db   : > { %763 = vrot.lane.b32.xlu0 %v2253_v9, %s1859_s26  ;;  %s1874_s26 = smov 111  }
 0x1dc   : > { %v477_v2 = vpop.permute.xlu2 %476 }
 0x1e2   : > { %818 = vrot.lane.b32.xlu1 %v2251_v62, %s1862_s27  ;;  %801 = vrot.lane.b32.xlu2 %v2253_v9, %s1863_s28 }
 0x1e3   : > { %799 = vrot.lane.b32.xlu0 %v2251_v62, %s1863_s28  ;;  %s1877_s28 = smov 99  }
 0x1e4   : > { %v496_v4 = vpop.permute.xlu2 %495 }
 0x1ea   : > { %839 = vrot.lane.b32.xlu1 %v2253_v9, %s1864_s6  ;;  %837 = vrot.lane.b32.xlu2 %v2251_v62, %s1864_s6  ;;  %s1878_s6 = smov 109  }
 0x1eb   : > { %820 = vrot.lane.b32.xlu0 %v2253_v9, %s1862_s27  ;;  %s1876_s27 = smov 110  }
 0x1ec   : > { %v517_v41 = vpop.permute.xlu2 %516 }
 0x1f2   : > { %875 = vrot.lane.b32.xlu1 %v2251_v62, %s1865_s7  ;;  %858 = vrot.lane.b32.xlu2 %v2253_v9, %s1866_s11 }
 0x1f3   : > { %856 = vrot.lane.b32.xlu0 %v2251_v62, %s1866_s11  ;;  %s1880_s11 = smov 96  }
 0x1f4   : > { %v459_v52 = vpop.permute.xlu1 %458  ;;  %v553_v10 = vpop.permute.xlu2 %552 }
 0x1f5   : > { %v457_v19 = vpop.permute.xlu0 %456 }
 0x1f6   : > { %v463_v44 = vsel %vm462_vm2, %v457_v19, %v459_v52  ;;  %v464_v33 = vsel %vm462_vm2, %v459_v52, %v457_v19  ;;  %vm784_vm2 = vcmp.lt.s32.totalorder %v2299_v39, 16 }
 0x1f7   : > { %v472_v32 = vmul.f32 %v2059_v17, %v464_v33  ;;  %v473_v26 = vmul.f32 %v2061_v18, %v463_v44 }
 0x1fa   : > { %896 = vrot.lane.b32.xlu1 %v2253_v9, %s1867_s12  ;;  %894 = vrot.lane.b32.xlu2 %v2251_v62, %s1867_s12  ;;  %s1881_s12 = smov 97  }
 0x1fb   : > { %877 = vrot.lane.b32.xlu0 %v2253_v9, %s1865_s7  ;;  %s1879_s7 = smov 98  }
 0x1fc   : > { %v498_v56 = vpop.permute.xlu1 %497  ;;  %v2310_v42 = vpop.permute.xlu2 %573 }
 0x1fd   : > { %v500_v51 = vsel %vm499_vm3, %v496_v4, %v498_v56  ;;  %v501_v5 = vsel %vm499_vm3, %v498_v56, %v496_v4  ;;  %v479_v6 = vpop.permute.xlu0 %478  ;;  %vm765_vm3 = vcmp.lt.s32.totalorder %v2299_v39, 17 }
 0x1fe   : > { %v481_v14 = vsel %vm480_vm4, %v477_v2, %v479_v6  ;;  %v482_v35 = vsel %vm480_vm4, %v479_v6, %v477_v2  ;;  %v510_v46 = vmul.f32 %v2079_v40, %v501_v5  ;;  %v511_v0 = vmul.f32 %v2081_v45, %v500_v51  ;;  %v2333_v5 = vld.sshfl [vmem:[#allocation1 + $0x8] sm:$0xff pattern:$0x73625140] }
 0x1ff   : > { %v491_v47 = vmul.f32 %v2063_v24, %v482_v35  ;;  %v492_v53 = vmul.f32 %v2065_v25, %v481_v14  ;;  %v933_v6 = vld [vmem:[#allocation5 + $0x64] sm:$0xf]  ;;  %vm803_vm4 = vcmp.lt.s32.totalorder %v2299_v39, 15 }
 0x201   : > { %v493_v1 = vadd.f32 %v491_v47, %v472_v32  ;;  %v494_v11 = vadd.f32 %v492_v53, %v473_v26 }
 0x202   : > { %944 = vrot.lane.b32.xlu1 %v2251_v62, %s1868_s13  ;;  %927 = vrot.lane.b32.xlu2 %v2253_v9, %s1869_s10 }
 0x203   : > { %v512_v48 = vadd.f32 %v510_v46, %v493_v1  ;;  %v513_v17 = vadd.f32 %v511_v0, %v494_v11  ;;  %925 = vrot.lane.b32.xlu0 %v2251_v62, %s1869_s10  ;;  %s1883_s10 = smov 93  }
 0x204   : > { %v534_v18 = vpop.permute.xlu1 %533  ;;  %v610_v24 = vpop.permute.xlu2 %609 }
 0x205   : > { %v515_v25 = vpop.permute.xlu0 %514 }
 0x206   : > { %v519_v40 = vsel %vm518_vm5, %v515_v25, %v517_v41  ;;  %v520_v2 = vsel %vm518_vm5, %v517_v41, %v515_v25  ;;  %vm841_vm5 = vcmp.lt.s32.totalorder %v2299_v39, 13 }
 0x207   : > { %v529_v45 = vmul.f32 %v2091_v63, %v520_v2  ;;  %v530_v4 = vmul.f32 %v2093_v8, %v519_v40  ;;  %v2331_v8 = vld.sshfl [vmem:[#allocation1] sm:$0xff pattern:$0x73625140] }
 0x208   : > { %935 = vst [vmem:[#allocation1] ss:$4 sm:$0xff] %v933_v6 }
 0x209   : > { %v531_v43 = vadd.f32 %v529_v45, %v512_v48  ;;  %v532_v52 = vadd.f32 %v530_v4, %v513_v17 }
 0x20a   : > { %965 = vrot.lane.b32.xlu1 %v2253_v9, %s1870_s14  ;;  %963 = vrot.lane.b32.xlu2 %v2251_v62, %s1870_s14  ;;  %s1884_s14 = smov 94  }
 0x20b   : > { %946 = vrot.lane.b32.xlu0 %v2253_v9, %s1868_s13  ;;  %s1882_s13 = smov 95  }
 0x20c   : > { %v555_v19 = vpop.permute.xlu1 %554  ;;  %v2329_v44 = vpop.permute.xlu2 %630 }
 0x20d   : > { %v557_v41 = vsel %vm556_vm6, %v553_v10, %v555_v19  ;;  %v558_v63 = vsel %vm556_vm6, %v555_v19, %v553_v10  ;;  %v536_v33 = vpop.permute.xlu0 %535  ;;  %vm822_vm6 = vcmp.lt.s32.totalorder %v2299_v39, 14 }
 0x20e   : > { %v538_v56 = vsel %vm537_vm7, %v534_v18, %v536_v33  ;;  %v539_v51 = vsel %vm537_vm7, %v536_v33, %v534_v18  ;;  %v567_v32 = vmul.f32 %v2108_v36, %v558_v63  ;;  %v568_v26 = vmul.f32 %v2110_v37, %v557_v41  ;;  %v952_v18 = vld [vmem:[#allocation5 + $0x68] sm:$0xf] }
 0x20f   : > { %v548_v14 = vmul.f32 %v2095_v22, %v539_v51  ;;  %v549_v35 = vmul.f32 %v2097_v23, %v538_v56  ;;  %v2347_v1 = vld.sshfl [vmem:[#allocation1] sm:$0xff pattern:$0x73625140]  ;;  %v2349_v11 = vld.sshfl [vmem:[#allocation1 + $0x8] sm:$0xff pattern:$0x73625140] }
 0x210   : > { %954 = vst [vmem:[#allocation1] ss:$4 sm:$0xff] %v952_v18  ;;  %v1009_v18 = vld [vmem:[#allocation5 + $0x74] sm:$0xf]  ;;  %vm860_vm7 = vcmp.lt.s32.totalorder %v2299_v39, 3 }
 0x211   : > { %v550_v47 = vadd.f32 %v548_v14, %v531_v43  ;;  %v551_v53 = vadd.f32 %v549_v35, %v532_v52  ;;  %v971_v52 = vld [vmem:[#allocation5 + $0x6c] sm:$0xf] }
 0x212   : > { %1001 = vrot.lane.b32.xlu1 %v2251_v62, %s1871_s30  ;;  %984 = vrot.lane.b32.xlu2 %v2253_v9, %s1872_s5 }
 0x213   : > { %982 = vrot.lane.b32.xlu0 %v2251_v62, %s1872_s5  ;;  %v569_v10 = vadd.f32 %v567_v32, %v550_v47  ;;  %v570_v46 = vadd.f32 %v568_v26, %v551_v53  ;;  %v990_v26 = vld [vmem:[#allocation5 + $0x70] sm:$0xf]  ;;  %s1886_s5 = smov 81  }
 0x214   : > { %v591_v22 = vpop.permute.xlu1 %590  ;;  %v2343_v23 = vpop.permute.xlu2 %666 }
 0x215   : > { %v572_v36 = vpop.permute.xlu0 %571 }
 0x216   : > { %v576_v37 = vsel %vm575_vm8, %v572_v36, %v2310_v42  ;;  %v577_v0 = vsel %vm575_vm8, %v2310_v42, %v572_v36  ;;  %vm898_vm8 = vcmp.lt.s32.totalorder %v2299_v39, 1 }
 0x217   : > { %v586_v48 = vmul.f32 %v2118_v49, %v577_v0  ;;  %v587_v17 = vmul.f32 %v2120_v50, %v576_v37  ;;  %v2362_v63 = vld.sshfl [vmem:[#allocation1] sm:$0xff pattern:$0x73625140]  ;;  %v2364_v33 = vld.sshfl [vmem:[#allocation1 + $0x8] sm:$0xff pattern:$0x73625140] }
 0x218   : > { %973 = vst [vmem:[#allocation1] ss:$4 sm:$0xff] %v971_v52 }
 0x219   : > { %v588_v25 = vadd.f32 %v586_v48, %v569_v10  ;;  %v589_v40 = vadd.f32 %v587_v17, %v570_v46 }
 0x21a   : > { %1022 = vrot.lane.b32.xlu1 %v2253_v9, %s1873_s21  ;;  %1020 = vrot.lane.b32.xlu2 %v2251_v62, %s1873_s21  ;;  %s1887_s21 = smov 82  }
 0x21b   : > { %1003 = vrot.lane.b32.xlu0 %v2253_v9, %s1871_s30  ;;  %s1885_s30 = smov 83  }
 0x21c   : > { %v612_v42 = vpop.permute.xlu1 %611  ;;  %v2358_v2 = vpop.permute.xlu2 %687 }
 0x21d   : > { %v614_v49 = vsel %vm613_vm9, %v610_v24, %v612_v42  ;;  %v615_v50 = vsel %vm613_vm9, %v612_v42, %v610_v24  ;;  %v593_v45 = vpop.permute.xlu0 %592  ;;  %vm879_vm9 = vcmp.lt.s32.totalorder %v2299_v39, 2 }
 0x21e   : > { %v595_v4 = vsel %vm594_vm10, %v591_v22, %v593_v45  ;;  %v596_v43 = vsel %vm594_vm10, %v593_v45, %v591_v22  ;;  %v624_v56 = vmul.f32 %v2127_v57, %v615_v50  ;;  %v625_v51 = vmul.f32 %v2129_v58, %v614_v49 }
 0x21f   : > { %v605_v19 = vmul.f32 %v2123_v54, %v596_v43  ;;  %v606_v41 = vmul.f32 %v2125_v55, %v595_v4  ;;  %v2378_v10 = vld.sshfl [vmem:[#allocation1] sm:$0xff pattern:$0x73625140]  ;;  %v2380_v46 = vld.sshfl [vmem:[#allocation1 + $0x8] sm:$0xff pattern:$0x73625140] }
 0x220   : > { %992 = vst [vmem:[#allocation1] ss:$4 sm:$0xff] %v990_v26  ;;  %v1047_v26 = vld [vmem:[#allocation5 + $0x7c] sm:$0xf]  ;;  %vm929_vm10 = vcmp.lt.s32.totalorder %v2299_v39, 127 }
 0x221   : > { %v607_v6 = vadd.f32 %v605_v19, %v588_v25  ;;  %v608_v14 = vadd.f32 %v606_v41, %v589_v40  ;;  %v1028_v41 = vld [vmem:[#allocation5 + $0x78] sm:$0xf] }
 0x222   : > { %1058 = vrot.lane.b32.xlu1 %v2251_v62, %s1874_s26  ;;  %1041 = vrot.lane.b32.xlu2 %v2253_v9, %s1875_s23 }
 0x223   : > { %1039 = vrot.lane.b32.xlu0 %v2251_v62, %s1875_s23  ;;  %v626_v54 = vadd.f32 %v624_v56, %v607_v6  ;;  %v627_v55 = vadd.f32 %v625_v51, %v608_v14  ;;  %s1889_s23 = smov 78  }
 0x224   : > { %v648_v24 = vpop.permute.xlu1 %647  ;;  %v2372_v35 = vpop.permute.xlu2 %723 }
 0x225   : > { %v629_v57 = vpop.permute.xlu0 %628 }
 0x226   : > { %v633_v58 = vsel %vm632_vm11, %v629_v57, %v2329_v44  ;;  %v634_v32 = vsel %vm632_vm11, %v2329_v44, %v629_v57  ;;  %vm967_vm11 = vcmp.lt.s32.totalorder %v2299_v39, 125 }
 0x227   : > { %v643_v47 = vmul.f32 %v2131_v60, %v634_v32  ;;  %v644_v53 = vmul.f32 %v2133_v61, %v633_v58  ;;  %v2393_v42 = vld.sshfl [vmem:[#allocation1] sm:$0xff pattern:$0x73625140]  ;;  %v2395_v49 = vld.sshfl [vmem:[#allocation1 + $0x8] sm:$0xff pattern:$0x73625140] }
 0x228   : > { %1011 = vst [vmem:[#allocation1] ss:$4 sm:$0xff] %v1009_v18  ;;  %v1066_v18 = vld [vmem:[#allocation5 + $0x80] sm:$0xf] }
 0x229   : > { %v645_v22 = vadd.f32 %v643_v47, %v626_v54  ;;  %v646_v36 = vadd.f32 %v644_v53, %v627_v55 }
 0x22a   : > { %1079 = vrot.lane.b32.xlu1 %v2253_v9, %s1876_s27  ;;  %1077 = vrot.lane.b32.xlu2 %v2251_v62, %s1876_s27  ;;  %s1890_s27 = smov 79  }
 0x22b   : > { %1060 = vrot.lane.b32.xlu0 %v2253_v9, %s1874_s26  ;;  %s1888_s26 = smov 80  }
 0x22c   : > { %v669_v60 = vpop.permute.xlu1 %668  ;;  %v2387_v61 = vpop.permute.xlu2 %744 }
 0x22d   : > { %v671_v44 = vsel %vm670_vm12, %v2343_v23, %v669_v60  ;;  %v672_v37 = vsel %vm670_vm12, %v669_v60, %v2343_v23  ;;  %v650_v0 = vpop.permute.xlu0 %649  ;;  %vm948_vm12 = vcmp.lt.s32.totalorder %v2299_v39, 126 }
 0x22e   : > { %v652_v48 = vsel %vm651_vm13, %v648_v24, %v650_v0  ;;  %v653_v17 = vsel %vm651_vm13, %v650_v0, %v648_v24  ;;  %v681_v50 = vmul.f32 %v2139_v12, %v672_v37  ;;  %v682_v45 = vmul.f32 %v2141_v13, %v671_v44 }
 0x22f   : > { %v662_v25 = vmul.f32 %v2135_v3, %v653_v17  ;;  %v663_v40 = vmul.f32 %v2137_v7, %v652_v48  ;;  %v2409_v6 = vld.sshfl [vmem:[#allocation1] sm:$0xff pattern:$0x73625140]  ;;  %v2411_v14 = vld.sshfl [vmem:[#allocation1 + $0x8] sm:$0xff pattern:$0x73625140] }
 0x230   : > { %1030 = vst [vmem:[#allocation1] ss:$4 sm:$0xff] %v1028_v41  ;;  %vm986_vm13 = vcmp.lt.s32.totalorder %v2299_v39, 115 }
 0x231   : > { %v664_v4 = vadd.f32 %v662_v25, %v645_v22  ;;  %v665_v43 = vadd.f32 %v663_v40, %v646_v36 }
 0x232   : > { %1115 = vrot.lane.b32.xlu1 %v2251_v62, %s1877_s28  ;;  %1098 = vrot.lane.b32.xlu2 %v2253_v9, %s1878_s6 }
 0x233   : > { %1096 = vrot.lane.b32.xlu0 %v2251_v62, %s1878_s6  ;;  %v683_v3 = vadd.f32 %v681_v50, %v664_v4  ;;  %v684_v7 = vadd.f32 %v682_v45, %v665_v43  ;;  %s1572_s6 = sshll.u32 %s1939_s19, 6  ;;  %s234_s19 = scalar_lea.vmem [#allocation7], %s1557_s24 }
 0x234   : > { %v705_v23 = vpop.permute.xlu1 %704  ;;  %v2403_v52 = vpop.permute.xlu2 %780  ;;  %s1451_s24 = scalar_lea.sflag [#allocation4], %s2013_s20 }
 0x235   : > { %v686_v12 = vpop.permute.xlu0 %685 }
 0x236   : > { %v690_v13 = vsel %vm689_vm14, %v686_v12, %v2358_v2  ;;  %v691_v19 = vsel %vm689_vm14, %v2358_v2, %v686_v12  ;;  %vm1005_vm14 = vcmp.lt.s32.totalorder %v2299_v39, 114 }
 0x237   : > { %v700_v56 = vmul.f32 %v2143_v15, %v691_v19  ;;  %v701_v51 = vmul.f32 %v2145_v16, %v690_v13  ;;  %v2424_v22 = vld.sshfl [vmem:[#allocation1] sm:$0xff pattern:$0x73625140]  ;;  %v2426_v36 = vld.sshfl [vmem:[#allocation1 + $0x8] sm:$0xff pattern:$0x73625140] }
 0x238   : > { %1049 = vst [vmem:[#allocation1] ss:$4 sm:$0xff] %v1047_v26  ;;  %v1085_v13 = vld [vmem:[#allocation5 + $0x84] sm:$0xf] }
 0x239   : > { %v702_v54 = vadd.f32 %v700_v56, %v683_v3  ;;  %v703_v55 = vadd.f32 %v701_v51, %v684_v7  ;;  %v2753_v19 = vld [vmem:[#allocation11_spill] sm:$0xff]  ;;  %v2754_v56 = vld [vmem:[#allocation12_spill] sm:$0xff] }
 0x23a   : > { %1136 = vrot.lane.b32.xlu1 %v2253_v9, %s1879_s7  ;;  %1134 = vrot.lane.b32.xlu2 %v2251_v62, %s1879_s7 }
 0x23b   : > { %1117 = vrot.lane.b32.xlu0 %v2253_v9, %s1877_s28  ;;  %s1891_s28 = smov 77  }
 0x23c   : > { %v726_v15 = vpop.permute.xlu1 %725  ;;  %v2418_v16 = vpop.permute.xlu2 %801 }
 0x23d   : > { %v728_v2 = vsel %vm727_vm15, %v2372_v35, %v726_v15  ;;  %v729_v24 = vsel %vm727_vm15, %v726_v15, %v2372_v35  ;;  %v707_v57 = vpop.permute.xlu0 %706  ;;  %v2755_v15 = vld [vmem:[#allocation13_spill] sm:$0xff]  ;;  %vm1024_vm15 = vcmp.lt.s32.totalorder %v2299_v39, 113 }
 0x23e   : > { %v709_v58 = vsel %vm708_vm0, %v705_v23, %v707_v57  ;;  %v710_v32 = vsel %vm708_vm0, %v707_v57, %v705_v23  ;;  %v738_v60 = vmul.f32 %v2151_v27, %v729_v24  ;;  %v739_v44 = vmul.f32 %v2153_v28, %v728_v2  ;;  %v2756_v24 = vld [vmem:[#allocation14_spill] sm:$0xff] }
 0x23f   : > { %v719_v47 = vmul.f32 %v2147_v20, %v710_v32  ;;  %v720_v53 = vmul.f32 %v2149_v21, %v709_v58  ;;  %v2440_v50 = vld.sshfl [vmem:[#allocation1] sm:$0xff pattern:$0x73625140]  ;;  %v2442_v45 = vld.sshfl [vmem:[#allocation1 + $0x8] sm:$0xff pattern:$0x73625140] }
 0x240   : > { %1068 = vst [vmem:[#allocation1] ss:$4 sm:$0xff] %v1066_v18  ;;  %vm1043_vm0 = vcmp.lt.s32.totalorder %v2299_v39, 112 }
 0x241   : > { %v721_v37 = vadd.f32 %v719_v47, %v702_v54  ;;  %v722_v0 = vadd.f32 %v720_v53, %v703_v55 }
 0x242   : > { %1172 = vrot.lane.b32.xlu1 %v2251_v62, %s1880_s11  ;;  %1155 = vrot.lane.b32.xlu2 %v2253_v9, %s1881_s12 }
 0x243   : > { %1153 = vrot.lane.b32.xlu0 %v2251_v62, %s1881_s12  ;;  %v740_v20 = vadd.f32 %v738_v60, %v721_v37  ;;  %v741_v21 = vadd.f32 %v739_v44, %v722_v0  ;;  %v1104_v0 = vld [vmem:[#allocation5 + $0x88] sm:$0xf]  ;;  %s1462_s12 = scalar_lea.hbm %s2721_s4, %s1572_s6 }
 0x244   : > { %v762_v35 = vpop.permute.xlu1 %761  ;;  %v2434_v48 = vpop.permute.xlu2 %837 }
 0x245   : > { %v743_v27 = vpop.permute.xlu0 %742 }
 0x246   : > { %v747_v28 = vsel %vm746_vm1, %v743_v27, %v2387_v61  ;;  %v748_v17 = vsel %vm746_vm1, %v2387_v61, %v743_v27  ;;  %vm1062_vm1 = vcmp.lt.s32.totalorder %v2299_v39, 111 }
 0x247   : > { %v757_v25 = vmul.f32 %v2155_v30, %v748_v17  ;;  %v758_v40 = vmul.f32 %v2157_v31, %v747_v28  ;;  %v2455_v54 = vld.sshfl [vmem:[#allocation1] sm:$0xff pattern:$0x73625140]  ;;  %v2457_v55 = vld.sshfl [vmem:[#allocation1 + $0x8] sm:$0xff pattern:$0x73625140] }
 0x248   : > { %1087 = vst [vmem:[#allocation1] ss:$4 sm:$0xff] %v1085_v13  ;;  %v2760_v13 = vld [vmem:[#allocation18_spill] sm:$0xff] }
 0x249   : > { %v759_v4 = vadd.f32 %v757_v25, %v740_v20  ;;  %v760_v43 = vadd.f32 %v758_v40, %v741_v21  ;;  %v2757_v20 = vld [vmem:[#allocation15_spill] sm:$0xff] }
 0x24a   : > { %1193 = vrot.lane.b32.xlu1 %v2253_v9, %s1882_s13  ;;  %1191 = vrot.lane.b32.xlu2 %v2251_v62, %s1882_s13  ;;  %s1463_s13 = sshll.u32 %s234_s19, 4  ;;  %s1464_s13 = int_to_ptr.vmem [resolvable:$true] %s1463_s13 }
 0x24b   : > { %1174 = vrot.lane.b32.xlu0 %v2253_v9, %s1880_s11 }
 0x24c   : > { %v783_v30 = vpop.permute.xlu1 %782  ;;  %v2449_v31 = vpop.permute.xlu2 %858 }
 0x24d   : > { %v785_v61 = vsel %vm784_vm2, %v2403_v52, %v783_v30  ;;  %v786_v3 = vsel %vm784_vm2, %v783_v30, %v2403_v52  ;;  %v764_v7 = vpop.permute.xlu0 %763  ;;  %vm1081_vm2 = vcmp.lt.s32.totalorder %v2299_v39, 110 }
 0x24e   : > { %v766_v23 = vsel %vm765_vm3, %v762_v35, %v764_v7  ;;  %v767_v12 = vsel %vm765_vm3, %v764_v7, %v762_v35  ;;  %v795_v2 = vmul.f32 %v2755_v15, %v786_v3  ;;  %v796_v57 = vmul.f32 %v2756_v24, %v785_v61  ;;  %v2758_v35 = vld [vmem:[#allocation16_spill] sm:$0xff] }
 0x24f   : > { %v776_v41 = vmul.f32 %v2753_v19, %v767_v12  ;;  %v777_v51 = vmul.f32 %v2754_v56, %v766_v23  ;;  %v2471_v28 = vld.sshfl [vmem:[#allocation1] sm:$0xff pattern:$0x73625140]  ;;  %v2473_v17 = vld.sshfl [vmem:[#allocation1 + $0x8] sm:$0xff pattern:$0x73625140] }
 0x250   : > { %1106 = vst [vmem:[#allocation1] ss:$4 sm:$0xff] %v1104_v0  ;;  %v1123_v7 = vld [vmem:[#allocation5 + $0x8c] sm:$0xf]  ;;  %v2759_v23 = vld [vmem:[#allocation17_spill] sm:$0xff]  ;;  %vm1100_vm3 = vcmp.lt.s32.totalorder %v2299_v39, 109 }
 0x251   : > { %v778_v58 = vadd.f32 %v776_v41, %v759_v4  ;;  %v779_v32 = vadd.f32 %v777_v51, %v760_v43  ;;  %v2761_v51 = vld [vmem:[#allocation19_spill] sm:$0xff]  ;;  %v2763_v0 = vld [vmem:[#allocation21_spill] sm:$0xff] }
 0x252   : > { %1229 = vrot.lane.b32.xlu1 %v2251_v62, %s1883_s10  ;;  %1212 = vrot.lane.b32.xlu2 %v2253_v9, %s1884_s14 }
 0x253   : > { %1210 = vrot.lane.b32.xlu0 %v2251_v62, %s1884_s14  ;;  %v797_v52 = vadd.f32 %v795_v2, %v778_v58  ;;  %v798_v26 = vadd.f32 %v796_v57, %v779_v32  ;;  %v2762_v2 = vld [vmem:[#allocation20_spill] sm:$0xff] }
 0x254   : > { %v819_v47 = vpop.permute.xlu1 %818  ;;  %v2465_v53 = vpop.permute.xlu2 %894 }
 0x255   : > { %v800_v60 = vpop.permute.xlu0 %799 }
 0x256   : > { %v804_v44 = vsel %vm803_vm4, %v800_v60, %v2418_v16  ;;  %v805_v37 = vsel %vm803_vm4, %v2418_v16, %v800_v60  ;;  %vm1119_vm4 = vcmp.lt.s32.totalorder %v2299_v39, 99 }
 0x257   : > { %v814_v21 = vmul.f32 %v2757_v20, %v805_v37  ;;  %v815_v27 = vmul.f32 %v2758_v35, %v804_v44  ;;  %v2486_v41 = vld.sshfl [vmem:[#allocation1] sm:$0xff pattern:$0x73625140]  ;;  %v2488_v56 = vld.sshfl [vmem:[#allocation1 + $0x8] sm:$0xff pattern:$0x73625140] }
 0x258   : > { %1125 = vst [vmem:[#allocation1] ss:$4 sm:$0xff] %v1123_v7  ;;  %v1142_v37 = vld [vmem:[#allocation5 + $0x90] sm:$0xf] }
 0x259   : > { %v816_v18 = vadd.f32 %v814_v21, %v797_v52  ;;  %v817_v25 = vadd.f32 %v815_v27, %v798_v26  ;;  %v2764_v21 = vld [vmem:[#allocation22_spill] sm:$0xff] }
 0x25a   : > { %1250 = vrot.lane.b32.xlu1 %v2253_v9, %s1885_s30  ;;  %1248 = vrot.lane.b32.xlu2 %v2251_v62, %s1885_s30 }
 0x25b   : > { %1231 = vrot.lane.b32.xlu0 %v2253_v9, %s1883_s10  ;;  %s1465_s10 = sshll.u32 %s1462_s12, 4  ;;  %s1466_s10 = int_to_ptr.hbm [resolvable:$true] %s1465_s10 }
 0x25c   : > { %v840_v16 = vpop.permute.xlu1 %839  ;;  %v2480_v40 = vpop.permute.xlu2 %927  ;;  %s1781_s14 = sshra.s32 %s1466_s10, 4  ;;  %s1782_s14 = int_to_ptr.hbm [resolvable:$true] %s1781_s14 }
 0x25d   : > { %v842_v4 = vsel %vm841_vm5, %v2434_v48, %v840_v16  ;;  %v843_v43 = vsel %vm841_vm5, %v840_v16, %v2434_v48  ;;  %v821_v30 = vpop.permute.xlu0 %820  ;;  %vm1138_vm5 = vcmp.lt.s32.totalorder %v2299_v39, 98  ;;  %s1783_s30 = scalar_lea.hbm %s1782_s14, 64  ;;  %p1788_p11 = scmp.lt.s32.totalorder %s1782_s14, %s2721_s4 }
 0x25e   : > { %v823_v61 = vsel %vm822_vm6, %v819_v47, %v821_v30  ;;  %v824_v3 = vsel %vm822_vm6, %v821_v30, %v819_v47  ;;  %v852_v15 = vmul.f32 %v2761_v51, %v843_v43  ;;  %v853_v24 = vmul.f32 %v2762_v2, %v842_v4  ;;  %p1784_p1 = scmp.ne.s32.totalorder %s1782_s14, %s1783_s30 }
 0x25f   : > { %v833_v12 = vmul.f32 %v2759_v23, %v824_v3  ;;  %v834_v19 = vmul.f32 %v2760_v13, %v823_v61  ;;  %v2502_v27 = vld.sshfl [vmem:[#allocation1] sm:$0xff pattern:$0x73625140]  ;;  %v1161_v23 = vld [vmem:[#allocation5 + $0x94] sm:$0xf]  ;;  %vm1157_vm6 = vcmp.lt.s32.totalorder %v2299_v39, 97 }
 0x260   : > { %p1785_p4 = pnand %p1784_p1, %p1985_p7 }
 0x261   : > { %v835_v57 = vadd.f32 %v833_v12, %v816_v18  ;;  %v836_v58 = vadd.f32 %v834_v19, %v817_v25  ;;  %v2504_v18 = vld.sshfl [vmem:[#allocation1 + $0x8] sm:$0xff pattern:$0x73625140]  ;;  %v2766_v19 = vld [vmem:[#allocation24_spill] sm:$0xff] }
 0x262   : > { %1286 = vrot.lane.b32.xlu1 %v2251_v62, %s1886_s5  ;;  %1269 = vrot.lane.b32.xlu2 %v2253_v9, %s1887_s21  ;;  %1144 = vst [vmem:[#allocation1] ss:$4 sm:$0xff] %v1142_v37  ;;  %v2765_v12 = vld [vmem:[#allocation23_spill] sm:$0xff]  ;;  %v922_v37 = vmul.f32 %v2333_v5, %v2253_v9  ;;  %p1786_p8 = pneg %p1785_p4 }
 0x263   : > { %1267 = vrot.lane.b32.xlu0 %v2251_v62, %s1887_s21  ;;  %v854_v48 = vadd.f32 %v852_v15, %v835_v57  ;;  %v855_v32 = vadd.f32 %v853_v24, %v836_v58  ;;  %v2767_v24 = vld [vmem:[#allocation25_spill] sm:$0xff]  ;;  %v2768_v58 = vld [vmem:[#allocation26_spill] sm:$0xff] }
 0x264   : > { %v876_v52 = vpop.permute.xlu1 %875  ;;  %v2496_v26 = vpop.permute.xlu2 %963 }
 0x265   : > { %v857_v47 = vpop.permute.xlu0 %856 }
 0x266   : > { %v861_v60 = vsel %vm860_vm7, %v857_v47, %v2449_v31  ;;  %v862_v44 = vsel %vm860_vm7, %v2449_v31, %v857_v47  ;;  %vm1195_vm7 = vcmp.lt.s32.totalorder %v2299_v39, 95 }
 0x267   : > { %v871_v20 = vmul.f32 %v2763_v0, %v862_v44  ;;  %v872_v35 = vmul.f32 %v2764_v21, %v861_v60 }
 0x269   : > { %v873_v25 = vadd.f32 %v871_v20, %v854_v48  ;;  %v874_v16 = vadd.f32 %v872_v35, %v855_v32  ;;  %v2517_v15 = vld.sshfl [vmem:[#allocation1] sm:$0xff pattern:$0x73625140]  ;;  %v2519_v2 = vld.sshfl [vmem:[#allocation1 + $0x8] sm:$0xff pattern:$0x73625140]  ;;  %v921_v20 = vmul.f32 %v2331_v8, %v2251_v62 }
 0x26a   : > { %1307 = vrot.lane.b32.xlu1 %v2253_v9, %s1888_s26  ;;  %1305 = vrot.lane.b32.xlu2 %v2251_v62, %s1888_s26  ;;  %1163 = vst [vmem:[#allocation1] ss:$4 sm:$0xff] %v1161_v23  ;;  %s1787_s26 = scalar_lea.hbm %s2721_s4, 128 }
 0x26b   : > { %1288 = vrot.lane.b32.xlu0 %v2253_v9, %s1886_s5  ;;  %p1789_p9 = scmp.lt.s32.totalorder %s1787_s26, %s1783_s30 }
 0x26c   : > { %v897_v31 = vpop.permute.xlu1 %896  ;;  %v2511_v4 = vpop.permute.xlu2 %984 }
 0x26d   : > { %v899_v43 = vsel %vm898_vm8, %v2465_v53, %v897_v31  ;;  %v900_v30 = vsel %vm898_vm8, %v897_v31, %v2465_v53  ;;  %v878_v61 = vpop.permute.xlu0 %877  ;;  %vm1176_vm8 = vcmp.lt.s32.totalorder %v2299_v39, 96  ;;  %p1790_p2 = por %p1789_p9, %p1788_p11 }
 0x26e   : > { %v880_v3 = vsel %vm879_vm9, %v876_v52, %v878_v61  ;;  %v881_v7 = vsel %vm879_vm9, %v878_v61, %v876_v52  ;;  %v909_v57 = vmul.f32 %v2767_v24, %v900_v30  ;;  %v910_v48 = vmul.f32 %v2768_v58, %v899_v43 }
 0x26f   : > { %v890_v13 = vmul.f32 %v2765_v12, %v881_v7  ;;  %v891_v51 = vmul.f32 %v2766_v19, %v880_v3  ;;  %vm1214_vm9 = vcmp.lt.s32.totalorder %v2299_v39, 94  ;;  %p1791_p10 = pnand %p1790_p2, %p1786_p8 }
 0x271   : > { %v892_v32 = vadd.f32 %v890_v13, %v873_v25  ;;  %v893_v47 = vadd.f32 %v891_v51, %v874_v16  ;;  %v1180_v25 = vld [vmem:[#allocation5 + $0x98] sm:$0xf]  ;;  %v2539_v3 = vld.sshfl [vmem:[#allocation1 + $0x8] sm:$0xff pattern:$0x73625140] }
 0x272   : > { %1343 = vrot.lane.b32.xlu1 %v2251_v62, %s1889_s23  ;;  %1326 = vrot.lane.b32.xlu2 %v2253_v9, %s1890_s27  ;;  %v2537_v61 = vld.sshfl [vmem:[#allocation1] sm:$0xff pattern:$0x73625140] }
 0x273   : > { %v911_v53 = vadd.f32 %v909_v57, %v892_v32  ;;  %v912_v52 = vadd.f32 %v910_v48, %v893_v47  ;;  %1324 = vrot.lane.b32.xlu0 %v2251_v62, %s1890_s27  ;;  %1182 = vst [vmem:[#allocation1] ss:$4 sm:$0xff] %v1180_v25  ;;  %v1199_v13 = vld [vmem:[#allocation5 + $0x9c] sm:$0xf] }
 0x274   : > { %v945_v60 = vpop.permute.xlu1 %944  ;;  %v2527_v44 = vpop.permute.xlu2 %1020 }
 0x275   : > { %v926_v0 = vpop.permute.xlu0 %925  ;;  %v924_v16 = vadd.f32 %v922_v37, %v912_v52  ;;  %v923_v31 = vadd.f32 %v921_v20, %v911_v53 }
 0x276   : > { %v930_v21 = vsel %vm929_vm10, %v926_v0, %v2480_v40  ;;  %v931_v35 = vsel %vm929_vm10, %v2480_v40, %v926_v0  ;;  %vm1252_vm10 = vcmp.lt.s32.totalorder %v2299_v39, 83 }
 0x277   : > { %v940_v43 = vmul.f32 %v2347_v1, %v930_v21  ;;  %v941_v30 = vmul.f32 %v2349_v11, %v931_v35 }
 0x279   : > { %v942_v5 = vadd.f32 %v940_v43, %v923_v31  ;;  %v943_v7 = vadd.f32 %v941_v30, %v924_v16  ;;  %v1237_v43 = vld [vmem:[#allocation5 + $0xa4] sm:$0xf] }
 0x27a   : > { %1364 = vrot.lane.b32.xlu1 %v2253_v9, %s1891_s28  ;;  %1362 = vrot.lane.b32.xlu2 %v2251_v62, %s1891_s28  ;;  %v2552_v24 = vld.sshfl [vmem:[#allocation1] sm:$0xff pattern:$0x73625140] }
 0x27b   : > { %1345 = vrot.lane.b32.xlu0 %v2253_v9, %s1889_s23  ;;  %v2554_v9 = vld.sshfl [vmem:[#allocation1 + $0x8] sm:$0xff pattern:$0x73625140] }
 0x27c   : > { %v966_v8 = vpop.permute.xlu1 %965  ;;  %v2548_v19 = vpop.permute.xlu2 %1041  ;;  %1201 = vst [vmem:[#allocation1] ss:$4 sm:$0xff] %v1199_v13 }
 0x27d   : > { %v968_v1 = vsel %vm967_vm11, %v2496_v26, %v966_v8  ;;  %v969_v11 = vsel %vm967_vm11, %v966_v8, %v2496_v26  ;;  %v947_v40 = vpop.permute.xlu0 %946  ;;  %vm1233_vm11 = vcmp.lt.s32.totalorder %v2299_v39, 93 }
 0x27e   : > { %v949_v23 = vsel %vm948_vm12, %v945_v60, %v947_v40  ;;  %v950_v12 = vsel %vm948_vm12, %v947_v40, %v945_v60  ;;  %v978_v57 = vmul.f32 %v2378_v10, %v968_v1  ;;  %v979_v58 = vmul.f32 %v2380_v46, %v969_v11  ;;  %v1218_v60 = vld [vmem:[#allocation5 + $0xa0] sm:$0xf] }
 0x27f   : > { %v959_v51 = vmul.f32 %v2362_v63, %v949_v23  ;;  %v960_v62 = vmul.f32 %v2364_v33, %v950_v12  ;;  %v1256_v23 = vld [vmem:[#allocation5 + $0xa8] sm:$0xf]  ;;  %vm1271_vm12 = vcmp.lt.s32.totalorder %v2299_v39, 82 }
 0x281   : > { %v961_v26 = vadd.f32 %v959_v51, %v942_v5  ;;  %v962_v48 = vadd.f32 %v960_v62, %v943_v7  ;;  %v1275_v62 = vld [vmem:[#allocation5 + $0xac] sm:$0xf] }
 0x283   : > { %v981_v32 = vadd.f32 %v979_v58, %v962_v48  ;;  %v980_v47 = vadd.f32 %v978_v57, %v961_v26  ;;  %v2563_v10 = vld.sshfl [vmem:[#allocation1] sm:$0xff pattern:$0x73625140]  ;;  %v2565_v46 = vld.sshfl [vmem:[#allocation1 + $0x8] sm:$0xff pattern:$0x73625140] }
 0x284   : > { %v1002_v53 = vpop.permute.xlu1 %1001  ;;  %1220 = vst [vmem:[#allocation1] ss:$4 sm:$0xff] %v1218_v60  ;;  %v2567_v20 = vpop.permute.xlu2 %1077 }
 0x285   : > { %v983_v52 = vpop.permute.xlu0 %982 }
 0x286   : > { %v987_v63 = vsel %vm986_vm13, %v983_v52, %v2511_v4  ;;  %v988_v33 = vsel %vm986_vm13, %v2511_v4, %v983_v52  ;;  %vm1290_vm13 = vcmp.lt.s32.totalorder %v2299_v39, 81 }
 0x287   : > { %v997_v37 = vmul.f32 %v2393_v42, %v987_v63  ;;  %v998_v0 = vmul.f32 %v2395_v49, %v988_v33 }
 0x289   : > { %v999_v21 = vadd.f32 %v997_v37, %v980_v47  ;;  %v1000_v35 = vadd.f32 %v998_v0, %v981_v32  ;;  %v1294_v32 = vld [vmem:[#allocation5 + $0xb0] sm:$0xf] }
 0x28b   : > { %v2572_v30 = vld.sshfl [vmem:[#allocation1] sm:$0xff pattern:$0x73625140]  ;;  %v2574_v5 = vld.sshfl [vmem:[#allocation1 + $0x8] sm:$0xff pattern:$0x73625140] }
 0x28c   : > { %v1023_v25 = vpop.permute.xlu1 %1022  ;;  %1239 = vst [vmem:[#allocation1] ss:$4 sm:$0xff] %v1237_v43  ;;  %v1099_v1 = vpop.permute.xlu2 %1098 }
 0x28d   : > { %v1004_v16 = vpop.permute.xlu0 %1003  ;;  %v1025_v63 = vsel %vm1024_vm15, %v2527_v44, %v1023_v25  ;;  %v1026_v33 = vsel %vm1024_vm15, %v1023_v25, %v2527_v44  ;;  %vm1328_vm15 = vcmp.lt.s32.totalorder %v2299_v39, 79 }
 0x28e   : > { %v1006_v31 = vsel %vm1005_vm14, %v1002_v53, %v1004_v16  ;;  %v1007_v4 = vsel %vm1005_vm14, %v1004_v16, %v1002_v53  ;;  %v1036_v16 = vmul.f32 %v2426_v36, %v1026_v33  ;;  %vm1309_vm14 = vcmp.lt.s32.totalorder %v2299_v39, 80 }
 0x28f   : > { %v1016_v42 = vmul.f32 %v2409_v6, %v1006_v31  ;;  %v1017_v49 = vmul.f32 %v2411_v14, %v1007_v4 }
 0x291   : > { %v1018_v7 = vadd.f32 %v1016_v42, %v999_v21  ;;  %v1019_v8 = vadd.f32 %v1017_v49, %v1000_v35  ;;  %v1035_v35 = vmul.f32 %v2424_v22, %v1025_v63  ;;  %v1313_v22 = vld [vmem:[#allocation5 + $0xb4] sm:$0xf] }
 0x293   : > { %v2576_v12 = vld.sshfl [vmem:[#allocation1] sm:$0xff pattern:$0x73625140]  ;;  %v2578_v13 = vld.sshfl [vmem:[#allocation1 + $0x8] sm:$0xff pattern:$0x73625140]  ;;  %v1038_v25 = vadd.f32 %v1036_v16, %v1019_v8  ;;  %v1037_v43 = vadd.f32 %v1035_v35, %v1018_v7 }
 0x294   : > { %v1059_v11 = vpop.permute.xlu1 %1058  ;;  %1258 = vst [vmem:[#allocation1] ss:$4 sm:$0xff] %v1256_v23  ;;  %v2580_v6 = vpop.permute.xlu2 %1134 }
 0x295   : > { %v1040_v40 = vpop.permute.xlu0 %1039 }
 0x296   : > { %v1044_v60 = vsel %vm1043_vm0, %v1040_v40, %v2548_v19  ;;  %v1045_v37 = vsel %vm1043_vm0, %v2548_v19, %v1040_v40  ;;  %vm1366_vm0 = vcmp.lt.s32.totalorder %v2299_v39, 77 }
 0x297   : > { %v1054_v31 = vmul.f32 %v2440_v50, %v1044_v60  ;;  %v1055_v4 = vmul.f32 %v2442_v45, %v1045_v37 }
 0x299   : > { %v1056_v36 = vadd.f32 %v1054_v31, %v1037_v43 }
 0x29b   : > { %v2582_v57 = vld.sshfl [vmem:[#allocation1] sm:$0xff pattern:$0x73625140]  ;;  %v2584_v58 = vld.sshfl [vmem:[#allocation1 + $0x8] sm:$0xff pattern:$0x73625140] }
 0x29c   : > { %v1080_v51 = vpop.permute.xlu1 %1079  ;;  %1277 = vst [vmem:[#allocation1] ss:$4 sm:$0xff] %v1275_v62  ;;  %v1156_v47 = vpop.permute.xlu2 %1155 }
 0x29d   : > { %v1061_v14 = vpop.permute.xlu0 %1060  ;;  %v1082_v40 = vsel %vm1081_vm2, %v2567_v20, %v1080_v51  ;;  %v1083_v23 = vsel %vm1081_vm2, %v1080_v51, %v2567_v20  ;;  %vm1381_vm2 = vcmask 1041408  }
 0x29e   : > { %v1063_v0 = vsel %vm1062_vm1, %v1059_v11, %v1061_v14  ;;  %v1064_v21 = vsel %vm1062_vm1, %v1061_v14, %v1059_v11  ;;  %v1057_v11 = vadd.f32 %v1055_v4, %v1038_v25  ;;  %v1092_v63 = vmul.f32 %v2471_v28, %v1082_v40 }
 0x29f   : > { %v1073_v19 = vmul.f32 %v2455_v54, %v1063_v0  ;;  %v1074_v42 = vmul.f32 %v2457_v55, %v1064_v21  ;;  %v1093_v33 = vmul.f32 %v2473_v17, %v1083_v23  ;;  %v1332_v21 = vld [vmem:[#allocation5 + $0xb8] sm:$0xf]  ;;  %vm1347_vm1 = vcmp.lt.s32.totalorder %v2299_v39, 78 }
 0x2a1   : > { %v1075_v55 = vadd.f32 %v1073_v19, %v1056_v36  ;;  %v1076_v8 = vadd.f32 %v1074_v42, %v1057_v11 }
 0x2a3   : > { %v2589_v53 = vld.sshfl [vmem:[#allocation1] sm:$0xff pattern:$0x73625140]  ;;  %v2591_v52 = vld.sshfl [vmem:[#allocation1 + $0x8] sm:$0xff pattern:$0x73625140] }
 0x2a4   : > { %v1116_v26 = vpop.permute.xlu1 %1115  ;;  %1296 = vst [vmem:[#allocation1] ss:$4 sm:$0xff] %v1294_v32  ;;  %v1192_v14 = vpop.permute.xlu2 %1191 }
 0x2a5   : > { %v1097_v48 = vpop.permute.xlu0 %1096 }
 0x2a6   : > { %v1101_v7 = vsel %vm1100_vm3, %v1097_v48, %v1099_v1  ;;  %v1102_v54 = vsel %vm1100_vm3, %v1099_v1, %v1097_v48  ;;  %v1095_v1 = vadd.f32 %v1093_v33, %v1076_v8  ;;  %v1094_v48 = vadd.f32 %v1092_v63, %v1075_v55 }
 0x2a7   : > { %v1111_v60 = vmul.f32 %v2486_v41, %v1101_v7  ;;  %v1112_v20 = vmul.f32 %v2488_v56, %v1102_v54  ;;  %v1351_v7 = vld [vmem:[#allocation5 + $0xbc] sm:$0xf] }
 0x2a9   : > { %v1113_v28 = vadd.f32 %v1111_v60, %v1094_v48  ;;  %v1114_v35 = vadd.f32 %v1112_v20, %v1095_v1  ;;  %v1370_v1 = vld [vmem:[#allocation5 + $0xc0] sm:$0xf] }
 0x2ab   : > { %v2606_v50 = vld.sshfl [vmem:[#allocation1] sm:$0xff pattern:$0x73625140]  ;;  %v2608_v45 = vld.sshfl [vmem:[#allocation1 + $0x8] sm:$0xff pattern:$0x73625140] }
 0x2ac   : > { %v1137_v44 = vpop.permute.xlu1 %1136  ;;  %1315 = vst [vmem:[#allocation1] ss:$4 sm:$0xff] %v1313_v22  ;;  %v1213_v19 = vpop.permute.xlu2 %1212 }
 0x2ad   : > { %v1118_v49 = vpop.permute.xlu0 %1117  ;;  %v1139_v56 = vsel %vm1138_vm5, %v2580_v6, %v1137_v44  ;;  %v1140_v16 = vsel %vm1138_vm5, %v1137_v44, %v2580_v6 }
 0x2ae   : > { %v1120_v62 = vsel %vm1119_vm4, %v1116_v26, %v1118_v49  ;;  %v1121_v32 = vsel %vm1119_vm4, %v1118_v49, %v1116_v26 }
 0x2af   : > { %v1130_v37 = vmul.f32 %v2502_v27, %v1120_v62  ;;  %v1131_v0 = vmul.f32 %v2504_v18, %v1121_v32  ;;  %v1149_v27 = vmul.f32 %v2517_v15, %v1139_v56  ;;  %v1150_v18 = vmul.f32 %v2519_v2, %v1140_v16 }
 0x2b1   : > { %v1132_v25 = vadd.f32 %v1130_v37, %v1113_v28  ;;  %v1133_v43 = vadd.f32 %v1131_v0, %v1114_v35 }
 0x2b3   : > { %v2624_v17 = vld.sshfl [vmem:[#allocation1] sm:$0xff pattern:$0x73625140]  ;;  %v2626_v41 = vld.sshfl [vmem:[#allocation1 + $0x8] sm:$0xff pattern:$0x73625140]  ;;  %v1152_v6 = vadd.f32 %v1150_v18, %v1133_v43  ;;  %v1151_v44 = vadd.f32 %v1149_v27, %v1132_v25 }
 0x2b4   : > { %v1173_v51 = vpop.permute.xlu1 %1172  ;;  %1334 = vst [vmem:[#allocation1] ss:$4 sm:$0xff] %v1332_v21  ;;  %v1249_v20 = vpop.permute.xlu2 %1248 }
 0x2b5   : > { %v1154_v26 = vpop.permute.xlu0 %1153 }
 0x2b6   : > { %v1158_v31 = vsel %vm1157_vm6, %v1154_v26, %v1156_v47  ;;  %v1159_v4 = vsel %vm1157_vm6, %v1156_v47, %v1154_v26 }
 0x2b7   : > { %v1168_v42 = vmul.f32 %v2537_v61, %v1158_v31  ;;  %v1169_v49 = vmul.f32 %v2539_v3, %v1159_v4 }
 0x2b9   : > { %v1170_v54 = vadd.f32 %v1168_v42, %v1151_v44  ;;  %v1171_v55 = vadd.f32 %v1169_v49, %v1152_v6 }
 0x2bb   : > { %v2638_v8 = vld.sshfl [vmem:[#allocation1] sm:$0xff pattern:$0x73625140]  ;;  %v2640_v61 = vld.sshfl [vmem:[#allocation1 + $0x8] sm:$0xff pattern:$0x73625140] }
 0x2bc   : > { %v1194_v22 = vpop.permute.xlu1 %1193  ;;  %1353 = vst [vmem:[#allocation1] ss:$4 sm:$0xff] %v1351_v7 }
 0x2bd   : > { %v1175_v47 = vpop.permute.xlu0 %1174  ;;  %v1196_v36 = vsel %vm1195_vm7, %v1192_v14, %v1194_v22  ;;  %v1197_v11 = vsel %vm1195_vm7, %v1194_v22, %v1192_v14 }
 0x2be   : > { %v1177_v40 = vsel %vm1176_vm8, %v1173_v51, %v1175_v47  ;;  %v1178_v23 = vsel %vm1176_vm8, %v1175_v47, %v1173_v51  ;;  %v1206_v3 = vmul.f32 %v2563_v10, %v1196_v36  ;;  %v1207_v62 = vmul.f32 %v2565_v46, %v1197_v11 }
 0x2bf   : > { %v1187_v15 = vmul.f32 %v2552_v24, %v1177_v40  ;;  %v1188_v2 = vmul.f32 %v2554_v9, %v1178_v23 }
 0x2c1   : > { %v1189_v32 = vadd.f32 %v1187_v15, %v1170_v54  ;;  %v1190_v14 = vadd.f32 %v1188_v2, %v1171_v55 }
 0x2c3   : > { %v1209_v63 = vadd.f32 %v1207_v62, %v1190_v14  ;;  %v1208_v33 = vadd.f32 %v1206_v3, %v1189_v32  ;;  %v2647_v0 = vld.sshfl [vmem:[#allocation1] sm:$0xff pattern:$0x73625140]  ;;  %v2649_v10 = vld.sshfl [vmem:[#allocation1 + $0x8] sm:$0xff pattern:$0x73625140] }
 0x2c4   : > { %v1230_v60 = vpop.permute.xlu1 %1229  ;;  %1372 = vst [vmem:[#allocation1] ss:$4 sm:$0xff] %v1370_v1 }
 0x2c5   : > { %v1211_v24 = vpop.permute.xlu0 %1210 }
 0x2c6   : > { %v1215_v51 = vsel %vm1214_vm9, %v1211_v24, %v1213_v19  ;;  %v1216_v9 = vsel %vm1214_vm9, %v1213_v19, %v1211_v24 }
 0x2c7   : > { %v1225_v48 = vmul.f32 %v2572_v30, %v1215_v51  ;;  %v1226_v37 = vmul.f32 %v2574_v5, %v1216_v9  ;;  %v1270_v30 = vpop.permute.xlu2 %1269 }
 0x2c9   : > { %v1227_v46 = vadd.f32 %v1225_v48, %v1208_v33  ;;  %v1228_v26 = vadd.f32 %v1226_v37, %v1209_v63 }
 0x2cb   : > { %v1373_v1 = vld.sshfl [vmem:[#allocation1] sm:$0xff pattern:$0x73625140]  ;;  %v1374_v48 = vld.sshfl [vmem:[#allocation1 + $0x8] sm:$0xff pattern:$0x73625140] }
 0x2cc   : > { %v1251_v21 = vpop.permute.xlu1 %1250 }
 0x2cd   : > { %v1232_v28 = vpop.permute.xlu0 %1231  ;;  %v1253_v35 = vsel %vm1252_vm10, %v1249_v20, %v1251_v21  ;;  %v1254_v56 = vsel %vm1252_vm10, %v1251_v21, %v1249_v20 }
 0x2ce   : > { %v1234_v16 = vsel %vm1233_vm11, %v1230_v60, %v1232_v28  ;;  %v1235_v31 = vsel %vm1233_vm11, %v1232_v28, %v1230_v60  ;;  %v1263_v25 = vmul.f32 %v2582_v57, %v1253_v35  ;;  %v1264_v43 = vmul.f32 %v2584_v58, %v1254_v56 }
 0x2cf   : > { %v1244_v5 = vmul.f32 %v2576_v12, %v1234_v16  ;;  %v1245_v4 = vmul.f32 %v2578_v13, %v1235_v31  ;;  %v1306_v47 = vpop.permute.xlu2 %1305 }
 0x2d1   : > { %v1246_v27 = vadd.f32 %v1244_v5, %v1227_v46  ;;  %v1247_v18 = vadd.f32 %v1245_v4, %v1228_v26 }
 0x2d3   : > { %v1266_v19 = vadd.f32 %v1264_v43, %v1247_v18  ;;  %v1265_v42 = vadd.f32 %v1263_v25, %v1246_v27 }
 0x2d4   : > { %v1287_v49 = vpop.permute.xlu1 %1286 }
 0x2d5   : > { %v1268_v22 = vpop.permute.xlu0 %1267 }
 0x2d6   : > { %v1273_v6 = vsel %vm1271_vm12, %v1270_v30, %v1268_v22  ;;  %v1272_v13 = vsel %vm1271_vm12, %v1268_v22, %v1270_v30 }
 0x2d7   : > { %v1283_v44 = vmul.f32 %v2591_v52, %v1273_v6  ;;  %v1327_v40 = vpop.permute.xlu2 %1326  ;;  %v1282_v23 = vmul.f32 %v2589_v53, %v1272_v13 }
 0x2d9   : > { %v1285_v36 = vadd.f32 %v1283_v44, %v1266_v19  ;;  %v1284_v15 = vadd.f32 %v1282_v23, %v1265_v42 }
 0x2dc   : > { %v1308_v12 = vpop.permute.xlu1 %1307 }
 0x2dd   : > { %v1289_v11 = vpop.permute.xlu0 %1288  ;;  %v1310_v2 = vsel %vm1309_vm14, %v1306_v47, %v1308_v12  ;;  %v1311_v3 = vsel %vm1309_vm14, %v1308_v12, %v1306_v47 }
 0x2de   : > { %v1291_v57 = vsel %vm1290_vm13, %v1287_v49, %v1289_v11  ;;  %v1292_v58 = vsel %vm1290_vm13, %v1289_v11, %v1287_v49  ;;  %v1320_v53 = vmul.f32 %v2624_v17, %v1310_v2 }
 0x2df   : > { %v1301_v54 = vmul.f32 %v2606_v50, %v1291_v57  ;;  %v1302_v55 = vmul.f32 %v2608_v45, %v1292_v58  ;;  %v1321_v50 = vmul.f32 %v2626_v41, %v1311_v3  ;;  %v1363_v20 = vpop.permute.xlu2 %1362 }
 0x2e1   : > { %v1303_v14 = vadd.f32 %v1301_v54, %v1284_v15  ;;  %v1304_v63 = vadd.f32 %v1302_v55, %v1285_v36 }
 0x2e3   : > { %v1323_v24 = vadd.f32 %v1321_v50, %v1304_v63  ;;  %v1322_v51 = vadd.f32 %v1320_v53, %v1303_v14 }
 0x2e4   : > { %v1344_v7 = vpop.permute.xlu1 %1343 }
 0x2e5   : > { %v1325_v52 = vpop.permute.xlu0 %1324 }
 0x2e6   : > { %v1329_v62 = vsel %vm1328_vm15, %v1325_v52, %v1327_v40  ;;  %v1330_v32 = vsel %vm1328_vm15, %v1327_v40, %v1325_v52 }
 0x2e7   : > { %v1339_v45 = vmul.f32 %v2638_v8, %v1329_v62  ;;  %v1340_v33 = vmul.f32 %v2640_v61, %v1330_v32 }
 0x2e9   : > { %v1341_v39 = vadd.f32 %v1339_v45, %v1322_v51  ;;  %v1342_v28 = vadd.f32 %v1340_v33, %v1323_v24 }
 0x2ec   : > { %v1365_v60 = vpop.permute.xlu1 %1364 }
 0x2ed   : > { %v1346_v9 = vpop.permute.xlu0 %1345  ;;  %v1367_v37 = vsel %vm1366_vm0, %v1363_v20, %v1365_v60  ;;  %v1368_v46 = vsel %vm1366_vm0, %v1365_v60, %v1363_v20 }
 0x2ee   : > { %v1348_v26 = vsel %vm1347_vm1, %v1344_v7, %v1346_v9  ;;  %v1349_v21 = vsel %vm1347_vm1, %v1346_v9, %v1344_v7  ;;  %v1377_v8 = vmul.f32 %v1373_v1, %v1367_v37  ;;  %v1378_v35 = vmul.f32 %v1374_v48, %v1368_v46  ;;  %v2769_v1 = vld [vmem:[#allocation27_spill] sm:$0xff]  ;;  %v2770_v37 = vld [vmem:[#allocation28_spill] sm:$0xff] }
 0x2ef   : > { %v1358_v17 = vmul.f32 %v2647_v0, %v1348_v26  ;;  %v1359_v41 = vmul.f32 %v2649_v10, %v1349_v21  ;;  %v2772_v26 = vld [vmem:[#allocation30_spill] sm:$0xff] }
 0x2f1   : > { %v1360_v61 = vadd.f32 %v1358_v17, %v1341_v39  ;;  %v1361_v56 = vadd.f32 %v1359_v41, %v1342_v28 }
 0x2f3   : > { %v1379_v16 = vadd.f32 %v1377_v8, %v1360_v61  ;;  %v1380_v31 = vadd.f32 %v1378_v35, %v1361_v56 }
 0x2f5   : > { %v1382_v30 = vsel %vm1381_vm2, %v1379_v16, 0.0  ;;  %v1389_v5 = vsel %vm1381_vm2, %v1380_v31, 0.0 }
 0x2f6   : > { %v1383_v4 = vrot.slane %v1382_v30, 4  ;;  %v1390_v25 = vrot.slane %v1389_v5, 4 }
 0x2f8   : > { %v1384_v43 = vadd.f32 %v1383_v4, %v1382_v30  ;;  %v1391_v27 = vadd.f32 %v1390_v25, %v1389_v5 }
 0x2fa   : > { %v1385_v18 = vrot.slane %v1384_v43, 2  ;;  %v1392_v19 = vrot.slane %v1391_v27, 2 }
 0x2fc   : > { %v1386_v42 = vadd.f32 %v1385_v18, %v1384_v43  ;;  %v1393_v49 = vadd.f32 %v1392_v19, %v1391_v27 }
 0x2fe   : > { %v1387_v0 = vrot.slane %v1386_v42, 1  ;;  %v1394_v22 = vrot.slane %v1393_v49, 1 }
 0x300   : > { %v1388_v10 = vadd.f32 %v1387_v0, %v1386_v42  ;;  %v1395_v6 = vadd.f32 %v1394_v22, %v1393_v49 }
 0x302   : > { %v1564_v44 = vmul.f32 -1.442695, %v1388_v10  ;;  %v1565_v47 = vmul.f32 -1.442695, %v1395_v6 }
 0x304   : > { %1699 = vpow2.f32 %v1564_v44 }
 0x305   : > { %1701 = vpow2.f32 %v1565_v47 }
 0x30a   : > { %v1700_v36 = vpop.eup %1699 }
 0x30b   : > { %v1702_v12 = vpop.eup %1701  ;;  %v1402_v11 = vadd.f32 1.0, %v1700_v36 }
 0x30c   : > { %v1403_v13 = vadd.f32 1.0, %v1702_v12 }
 0x30d   : > { %1703 = vrcp.f32 %v1402_v11  ;;  %v1415_v54 = vand.u32 2147483648, %v1402_v11  ;;  %v1413_v15 = vand.u32 2147483647, %v1402_v11  ;;  %vm1409_vm5 = vweird.f32 %v1402_v11 }
 0x30e   : > { %1705 = vrcp.f32 %v1403_v13  ;;  %v1430_v2 = vand.u32 2147483648, %v1403_v13  ;;  %v1428_v62 = vand.u32 2147483647, %v1403_v13  ;;  %vm1424_vm7 = vweird.f32 %v1403_v13 }
 0x30f   : > { %v1416_v14 = vor.u32 1.1754944e-38, %v1415_v54  ;;  %vm1414_vm8 = vcmp.eq.f32.partialorder %v1413_v15, 8.507059e+37 }
 0x310   : > { %v1431_v50 = vor.u32 1.1754944e-38, %v1430_v2  ;;  %vm1429_vm10 = vcmp.eq.f32.partialorder %v1428_v62, 8.507059e+37 }
 0x313   : > { %v1704_v57 = vpop.eup %1703 }
 0x314   : > { %v1706_v58 = vpop.eup %1705  ;;  %v1405_v40 = vmul.f32 %v1704_v57, %v1402_v11  ;;  %vm1410_vm3 = vweird.f32 %v1704_v57 }
 0x315   : > { %v1420_v23 = vmul.f32 %v1706_v58, %v1403_v13  ;;  %vm1425_vm4 = vweird.f32 %v1706_v58  ;;  %vm1411_vm6 = vmor %vm1409_vm5, %vm1410_vm3 }
 0x316   : > { %v1406_v7 = vsub.f32 1.0, %v1405_v40  ;;  %vm1426_vm9 = vmor %vm1424_vm7, %vm1425_vm4 }
 0x317   : > { %v1421_v55 = vsub.f32 1.0, %v1420_v23 }
 0x318   : > { %v1407_v52 = vmul.f32 %v1704_v57, %v1406_v7 }
 0x319   : > { %v1422_v3 = vmul.f32 %v1706_v58, %v1421_v55 }
 0x31a   : > { %v1408_v32 = vadd.f32 %v1704_v57, %v1407_v52 }
 0x31b   : > { %v1423_v63 = vadd.f32 %v1706_v58, %v1422_v3 }
 0x31c   : > { %v1412_v53 = vsel %vm1411_vm6, %v1704_v57, %v1408_v32 }
 0x31d   : > { %v1417_v45 = vsel %vm1414_vm8, %v1416_v14, %v1412_v53  ;;  %v1427_v33 = vsel %vm1426_vm9, %v1706_v58, %v1423_v63 }
 0x31e   : > { %v1432_v60 = vsel %vm1429_vm10, %v1431_v50, %v1427_v33  ;;  %v1434_v20 = vmul.f32 %v1417_v45, %v2215_v34  ;;  %v1436_v24 = vmul.f32 %v1417_v45, %v2209_v59  ;;  %v1438_v48 = vmul.f32 %v1417_v45, %v2769_v1  ;;  %v2771_v59 = vld [vmem:[#allocation29_spill] sm:$0xff] }
 0x31f   : > { %v1435_v51 = vmul.f32 %v1432_v60, %v2218_v38  ;;  %v1437_v9 = vmul.f32 %v1432_v60, %v2212_v29  ;;  %v1439_v46 = vmul.f32 %v1432_v60, %v2770_v37  ;;  %v1440_v34 = vmul.f32 %v1417_v45, %v2771_v59 }
 0x320   : > { %1442 = vst [vmem:[%s234_s19] sm:$0xff] %v1434_v20  ;;  %v1441_v21 = vmul.f32 %v1432_v60, %v2772_v26 }
 0x321   : > { %1443 = vst [vmem:[%s234_s19 + $0x8] sm:$0xff] %v1435_v51 }
 0x322   : > { %1444 = vst [vmem:[%s234_s19 + $0x10] sm:$0xff] %v1436_v24 }
 0x323   : > { %1445 = vst [vmem:[%s234_s19 + $0x18] sm:$0xff] %v1437_v9 }
 0x324   : > { %1446 = vst [vmem:[%s234_s19 + $0x20] sm:$0xff] %v1438_v48 }
 0x325   : > { %1447 = vst [vmem:[%s234_s19 + $0x28] sm:$0xff] %v1439_v46 }
 0x326   : > { %1448 = vst [vmem:[%s234_s19 + $0x30] sm:$0xff] %v1440_v34 }
 0x327   : > { %1449 = vst [vmem:[%s234_s19 + $0x38] sm:$0xff] %v1441_v21 }
 0x328   : > { %1794 = shalt.err (!%p1791_p10)
}
 0x329   : > { %s1892_s20 = smov 256  }
 0x32a   : > { %1579 = dma.vmem_to_hbm [thread:$0]  (%p1985_p7), %s1464_s13, 1024, %s1466_s10, %s1451_s24, %s1892_s20, %s1892_s20, %s1861_s25  }
 0x32b PF: > { %s1480_s28 = sand.u32 1, %s1825_s15   ;;  %p2773_p12 = scmp.ge.s32.totalorder %s1837_s18, 2 }
 0x32c   : > { %s1481_s6 = scalar_lea.sflag [#allocation4], %s1480_s28 }
 0x32d   : > { %p1590_p13 = pnand %p2773_p12, %p1953_p6 }
 0x32f   : > { %p1591_p0 = pneg %p1590_p13 }
 0x331   : > { %1820 = dma.done.wait (%p1591_p0), %s1481_s6, 1024  }
 0x332   : > { %1822 = vsyncadd (%p1591_p0), %s1481_s6, 4294966272  ;;  %p18_p3 = scmp.ge.s32.totalorder %s1971_s29, 4   ;;  %s2774_s15 = smov %s1829_s16 }
 0x333   : > { %s2775_s16 = smov %s1833_s17  ;;  %s2776_s17 = smov %s1981_s8 }
 0x334   : > { %s2777_s18 = smov %s1971_s29  ;;  %20 = sbr.rel (!%p18_p3) target bundleno = 6 (0x6), region = 133 }
 0x339   :  { %1487 = vsyncpa [#allocation3], 1 }
 0x33a   :  { %1489 = vsyncpa [#allocation3 + $0x1], 1 }
 0x33b   :  { %1490 = vsyncpa [#allocation6], 1 }
 0x33c   :  { %1491 = vsyncpa [#allocation4], 1 }
 0x33d   :  { %1493 = vsyncpa [#allocation4 + $0x1], 1 }

</bundles_post_ra>
